<compile_context>
chip_gen: v5e
topology: v5e:2x2
jax: 0.10.0
libtpu: 0.0.40
codegen_flags: <defaults>
</compile_context>

<pallas_src>
import functools

import jax
import jax.numpy as jnp
from jax.experimental import pallas as pl
from jax.experimental.pallas import tpu as pltpu

STRIDES = 3  # local spatio-temporal window size


# ----------------------------- helpers --------------------------------------

def _pick_block(R, target=512):
    """Largest row-block <= target that divides R and is a multiple of 8."""
    if R <= target:
        return R
    for br in range(target, 7, -1):
        if R % br == 0 and br % 8 == 0:
            return br
    return R  # fall back to a single block


# ----------------------------- Pallas kernels -------------------------------

def _linear_kernel(x_ref, w_ref, b_ref, o_ref, *, relu):
    y = jnp.dot(x_ref[...], w_ref[...], preferred_element_type=jnp.float32)
    y = y + b_ref[...]
    if relu:
        y = jnp.maximum(y, 0.0)
    o_ref[...] = y


def linear(x2d, w, b, relu=False, block_rows=512):
    """Row-tiled (R, Cin) @ (Cin, Cout) + b, optional ReLU."""
    R, Cin = x2d.shape
    Cout = w.shape[1]
    br = _pick_block(R, block_rows)
    return pl.pallas_call(
        functools.partial(_linear_kernel, relu=relu),
        out_shape=jax.ShapeDtypeStruct((R, Cout), jnp.float32),
        grid=(R // br,),
        in_specs=[pl.BlockSpec((br, Cin), lambda i: (i, 0)),
                  pl.BlockSpec((Cin, Cout), lambda i: (0, 0)),
                  pl.BlockSpec((1, Cout), lambda i: (0, 0))],
        out_specs=pl.BlockSpec((br, Cout), lambda i: (i, 0)),
        compiler_params=pltpu.CompilerParams(dimension_semantics=("parallel",)),
    )(x2d, w, b.reshape(1, Cout))


def _stsgcl_kernel(*refs, N, n_gcm):
    """Fused STSGCL step for one (batch, window) grid point.

    refs = [x(T*N,C), emb(T*N,C), adj(3N,3N),
            (gcm_w_l(Cin_l,2*Cout_l), gcm_b_l(1,2*Cout_l)) * n_gcm,
            dcn_w0(C,Cd), dcn_w1(C,Cd), dcn_b(1,Cd),
            out(N,Cout)]
    """
    x_ref, emb_ref, adj_ref = refs[:3]
    gcm_refs = refs[3:3 + 2 * n_gcm]
    w0_ref, w1_ref, bd_ref, o_ref = refs[3 + 2 * n_gcm:]

    w = pl.program_id(1)
    start = w * N
    if N % 8 == 0:
        start = pl.multiple_of(start, 8)    # sublane-aligned window start
    win = pl.ds(start, 3 * N)

    # Embedded local spatio-temporal window, (3N, C). Embeddings fused here.
    xw = x_ref[win, :] + emb_ref[win, :]

    # D_CN residual: only the last dilated (1,2)/dilation-2 conv contributes
    # (reproduces the non-chaining torch loop).
    res = (jnp.dot(xw[:N, :], w0_ref[...], preferred_element_type=jnp.float32)
           + jnp.dot(xw[2 * N:, :], w1_ref[...], preferred_element_type=jnp.float32)
           + bd_ref[...])

    adj = adj_ref[...]
    h = xw
    acc = None
    for l in range(n_gcm):                  # static unroll over GCM layers
        wl = gcm_refs[2 * l][...]           # (c_in, 2*c_out)  fused GLU weight
        bl = gcm_refs[2 * l + 1][...]       # (1, 2*c_out)
        c_out = wl.shape[1] // 2
        z = jnp.dot(adj, h, preferred_element_type=jnp.float32)
        lr = jnp.dot(z, wl, preferred_element_type=jnp.float32) + bl
        gate = pl.reciprocal(1.0 + jnp.exp(-lr[:, c_out:]), approx=True)
        h = lr[:, :c_out] * gate            # GLU
        mid = h[N:2 * N, :]                 # middle N vertices
        acc = mid if acc is None else jnp.maximum(acc, mid)

    o_ref[...] = acc + res


def stsgcl_forward(lp, x, adj_eff, N):
    """One STSGCL layer: (B, T, N, C) -> (B, T-2, N, Cout), one pallas_call."""
    B, T, _, C = x.shape
    W = T - STRIDES + 1
    n_gcm = len(lp['gcm_w'])
    Cout = lp['gcm_w'][-1].shape[-1] // 2
    Cd = lp['dcn_w0'].shape[1]
    assert Cd == Cout, "residual channel must match GCM output channel"
    # TODO(synk): D_CN's left zero-padding branch (T < receptive_field=4) is not
    # implemented; the torch model itself mis-broadcasts in that regime.
    assert T >= 4

    x2d = x.reshape(B, T * N, C)                                   # free reshape
    emb2d = (lp['temporal_emb'] + lp['spatial_emb']).reshape(T * N, C)

    in_specs = [
        pl.BlockSpec((None, T * N, C), lambda b, w: (b, 0, 0)),    # x, reused over w
        pl.BlockSpec((T * N, C), lambda b, w: (0, 0)),             # embeddings
        pl.BlockSpec((3 * N, 3 * N), lambda b, w: (0, 0)),         # adj_eff (resident)
    ]
    args = [x2d, emb2d, adj_eff]
    for l in range(n_gcm):
        wl, bl = lp['gcm_w'][l], lp['gcm_b'][l]                    # per-window weights
        in_specs.append(pl.BlockSpec((None,) + wl.shape[1:], lambda b, w: (w, 0, 0)))
        in_specs.append(pl.BlockSpec((None, 1, bl.shape[-1]), lambda b, w: (w, 0, 0)))
        args += [wl, bl.reshape(W, 1, -1)]
    in_specs += [pl.BlockSpec((C, Cd), lambda b, w: (0, 0)),
                 pl.BlockSpec((C, Cd), lambda b, w: (0, 0)),
                 pl.BlockSpec((1, Cd), lambda b, w: (0, 0))]
    args += [lp['dcn_w0'], lp['dcn_w1'], lp['dcn_b'].reshape(1, Cd)]

    return pl.pallas_call(
        functools.partial(_stsgcl_kernel, N=N, n_gcm=n_gcm),
        out_shape=jax.ShapeDtypeStruct((B, W, N, Cout), jnp.float32),
        grid=(B, W),
        in_specs=in_specs,
        out_specs=pl.BlockSpec((None, None, N, Cout), lambda b, w: (b, w, 0, 0)),
        compiler_params=pltpu.CompilerParams(
            dimension_semantics=("parallel", "parallel")),
    )(*args)


def _predict_kernel(x_ref, w1_ref, b1_ref, w2_ref, b2_ref, o_ref):
    h = jnp.dot(x_ref[...], w1_ref[...], preferred_element_type=jnp.float32)
    h = jnp.maximum(h + b1_ref[...], 0.0)
    o_ref[...] = (jnp.dot(h, w2_ref[...], preferred_element_type=jnp.float32)
                  + b2_ref[...])


def predict_heads(xp, w1, b1, w2_bd, b2, block_rows=512):
    """All horizon heads fused: (R, K) -> (R, horizon)."""
    R, K = xp.shape
    H1 = w1.shape[1]
    Hout = w2_bd.shape[1]
    br = _pick_block(R, block_rows)
    return pl.pallas_call(
        _predict_kernel,
        out_shape=jax.ShapeDtypeStruct((R, Hout), jnp.float32),
        grid=(R // br,),
        in_specs=[pl.BlockSpec((br, K), lambda i: (i, 0)),
                  pl.BlockSpec((K, H1), lambda i: (0, 0)),
                  pl.BlockSpec((1, H1), lambda i: (0, 0)),
                  pl.BlockSpec((H1, Hout), lambda i: (0, 0)),
                  pl.BlockSpec((1, Hout), lambda i: (0, 0))],
        out_specs=pl.BlockSpec((br, Hout), lambda i: (i, 0)),
        compiler_params=pltpu.CompilerParams(dimension_semantics=("parallel",)),
    )(xp, w1, b1.reshape(1, H1), w2_bd, b2.reshape(1, Hout))


# ------------------------------ model forward --------------------------------

def stsgcn_forward(params, x):
    """x: (B, Tin, N, Cin) -> (B, horizon, N)."""
    B, T, N, Cin = x.shape
    E = params['first_fc_w'].shape[1]
    h = linear(x.reshape(B * T * N, Cin), params['first_fc_w'],
               params['first_fc_b'], relu=True).reshape(B, T, N, E)

    adj_eff = params['adj'] * params['mask']          # use_mask=True path
    for lp in params['stsgcl']:
        h = stsgcl_forward(lp, h, adj_eff, N)

    Bh, Th, Nh, Ch = h.shape
    xp = h.transpose(0, 2, 1, 3).reshape(Bh * Nh, Th * Ch)
    pp = params['predict']
    out = predict_heads(xp, pp['w1'], pp['b1'], pp['w2_bd'], pp['b2'])
    horizon = pp['b2'].shape[0]
    return out.reshape(Bh, Nh, horizon).transpose(0, 2, 1)   # (B, horizon, N)


# ------------------------------ parameter init --------------------------------

def init_params(key, *, N, history, in_dim, emb, hidden_dims,
                out_layer_dim, horizon):
    keys = iter(jax.random.split(key, 1024))

    def rnd(shape, scale):
        return scale * jax.random.normal(next(keys), shape, dtype=jnp.float32)

    M = STRIDES * N
    adj = jax.random.uniform(next(keys), (M, M), dtype=jnp.float32)
    adj = jnp.where(jax.random.uniform(next(keys), (M, M)) > 0.5, adj, 0.0)
    mask = jnp.where(adj != 0, adj, 0.0)   # torch mask Parameter init (== adj)

    params = {'adj': adj, 'mask': mask,
              'first_fc_w': rnd((in_dim, emb), float(1.0 / in_dim ** 0.5)),
              'first_fc_b': rnd((emb,), 0.01)}

    layers = []
    cur_T, cur_C = history, emb
    for out_dims in hidden_dims:
        W = cur_T - STRIDES + 1
        lp = {'temporal_emb': rnd((1, cur_T, 1, cur_C), 3e-4),
              'spatial_emb': rnd((1, 1, N, cur_C), 3e-4)}
        gcm_w, gcm_b = [], []
        c_in = cur_C
        for c_out in out_dims:
            # Per-window fused GLU weight: columns [:c_out] = lhs, [c_out:] = rhs
            gcm_w.append(rnd((W, c_in, 2 * c_out), float(1.0 / c_in ** 0.5)))
            gcm_b.append(rnd((W, 2 * c_out), 0.01))
            c_in = c_out
        lp['gcm_w'] = gcm_w
        lp['gcm_b'] = gcm_b
        lp['dcn_w0'] = rnd((cur_C, out_dims[0]), float(1.0 / (2 * cur_C) ** 0.5))
        lp['dcn_w1'] = rnd((cur_C, out_dims[0]), float(1.0 / (2 * cur_C) ** 0.5))
        lp['dcn_b'] = rnd((out_dims[0],), 0.01)
        layers.append(lp)
        cur_T -= STRIDES - 1
        cur_C = out_dims[-1]
    params['stsgcl'] = layers

    # Fused prediction heads: W1 stacked along lanes, W2 block-diagonal.
    K = cur_C * cur_T
    w1 = jnp.concatenate([rnd((K, out_layer_dim), float(1.0 / K ** 0.5))
                          for _ in range(horizon)], axis=1)
    b1 = jnp.concatenate([rnd((out_layer_dim,), 0.01) for _ in range(horizon)])
    w2_bd = jnp.zeros((horizon * out_layer_dim, horizon), jnp.float32)
    for t in range(horizon):
        col = rnd((out_layer_dim,), float(1.0 / out_layer_dim ** 0.5))
        w2_bd = w2_bd.at[t * out_layer_dim:(t + 1) * out_layer_dim, t].set(col)
    b2 = jnp.concatenate([rnd((1,), 0.01) for _ in range(horizon)])
    params['predict'] = {'w1': w1, 'b1': b1, 'w2_bd': w2_bd, 'b2': b2}
    return params


# ------------------------------ pure-JAX reference ----------------------------

def _reference_forward(params, x):
    """Plain jnp implementation mirroring the PyTorch forward (for validation)."""
    B, T, N, Cin = x.shape
    h = jax.nn.relu(x.reshape(-1, Cin) @ params['first_fc_w']
                    + params['first_fc_b']).reshape(B, T, N, -1)
    adj_eff = params['adj'] * params['mask']
    for lp in params['stsgcl']:
        Bh, Th, _, C = h.shape
        xe = h + lp['temporal_emb'] + lp['spatial_emb']
        W = Th - STRIDES + 1
        outs = []
        for w in range(W):
            cur = xe[:, w:w + STRIDES].reshape(Bh, STRIDES * N, C)
            mids = []
            for l in range(len(lp['gcm_w'])):
                wl = lp['gcm_w'][l][w]
                bl = lp['gcm_b'][l][w]
                c_out = wl.shape[1] // 2
                z = jnp.einsum('nm,bmc->bnc', adj_eff, cur)
                lr = z @ wl + bl
                cur = lr[..., :c_out] * jax.nn.sigmoid(lr[..., c_out:])
                mids.append(cur[:, N:2 * N, :])
            outs.append(jnp.max(jnp.stack(mids, 0), 0))
        out = jnp.stack(outs, axis=1)                         # (B, W, N, Cout)
        res = (jnp.einsum('btnc,cd->btnd', xe[:, :W], lp['dcn_w0'])
               + jnp.einsum('btnc,cd->btnd', xe[:, 2:2 + W], lp['dcn_w1'])
               + lp['dcn_b'])
        h = out + res
    Bh, Th, Nh, Ch = h.shape
    xp = h.transpose(0, 2, 1, 3).reshape(Bh * Nh, Th * Ch)
    pp = params['predict']
    o1 = jax.nn.relu(xp @ pp['w1'] + pp['b1'])
    o2 = o1 @ pp['w2_bd'] + pp['b2']
    horizon = pp['b2'].shape[0]
    return o2.reshape(Bh, Nh, horizon).transpose(0, 2, 1)


# ------------------------------------ main ------------------------------------

if __name__ == "__main__":
    B, T, N, Cin = 2, 6, 8, 2          # batch, history, vertices, input dim
    emb = 16                           # first_layer_embedding_size
    hidden_dims = [[16, 16], [16, 16]] # two STSGCLs, each with two GLU graph convs
    out_layer_dim = 32
    horizon = 3

    key = jax.random.PRNGKey(0)
    kp, kx = jax.random.split(key)
    params = init_params(kp, N=N, history=T, in_dim=Cin, emb=emb,
                         hidden_dims=hidden_dims, out_layer_dim=out_layer_dim,
                         horizon=horizon)
    x = jax.random.normal(kx, (B, T, N, Cin), dtype=jnp.float32)

    out = jax.jit(stsgcn_forward)(params, x)
    out = jax.block_until_ready(out)
    assert out.shape == (B, horizon, N), out.shape
    assert jnp.all(jnp.isfinite(out))

    # Validate against the pure-JAX reference (loose tolerance: the GLU gate in
    # the kernel uses the EUP approximate reciprocal).
    ref = _reference_forward(params, x)
    assert jnp.allclose(out, ref, rtol=1e-1, atol=1e-1), \
        float(jnp.max(jnp.abs(out - ref)))

    print("KERNEL_OK")
</pallas_src>

<mosaic_0001>
module attributes {stable_mosaic.version = 11 : i64} {
  func.func @_linear_kernel(%arg0: i32, %arg1: memref<96x2xf32, #tpu.memory_space<vmem>>, %arg2: memref<2x16xf32, #tpu.memory_space<vmem>>, %arg3: memref<1x16xf32, #tpu.memory_space<vmem>>, %arg4: memref<96x16xf32, #tpu.memory_space<vmem>>) attributes {dimension_semantics = [#tpu.dimension_semantics<parallel>], iteration_bounds = array<i64: 1>, scalar_prefetch = 0 : i64, scratch_operands = 0 : i64, tpu.core_type = #tpu.core_type<tc>, window_params = [{transform_indices = @transform_0, window_bounds = array<i64: 96, 2>}, {pipeline_mode = #tpu.pipeline_mode<synchronous>, transform_indices = @transform_1, window_bounds = array<i64: 2, 16>}, {pipeline_mode = #tpu.pipeline_mode<synchronous>, transform_indices = @transform_2, window_bounds = array<i64: 1, 16>}, {transform_indices = @transform_3, window_bounds = array<i64: 96, 16>}]} {
    %c0 = arith.constant 0 : index
    %c0_0 = arith.constant 0 : index
    %0 = vector.load %arg1[%c0, %c0_0] : memref<96x2xf32, #tpu.memory_space<vmem>>, vector<96x2xf32>
    %c0_1 = arith.constant 0 : index
    %c0_2 = arith.constant 0 : index
    %1 = vector.load %arg2[%c0_1, %c0_2] : memref<2x16xf32, #tpu.memory_space<vmem>>, vector<2x16xf32>
    %cst = arith.constant dense<0.000000e+00> : vector<96x16xf32>
    %2 = tpu.matmul %0, %1, %cst {dimension_numbers = #tpu.dot_dimension_numbers<[1], [0], [0], [1], [0, 0, 1, 1], [], []>} : vector<96x2xf32>, vector<2x16xf32>, vector<96x16xf32> -> vector<96x16xf32>
    %c0_3 = arith.constant 0 : index
    %c0_4 = arith.constant 0 : index
    %3 = vector.load %arg3[%c0_3, %c0_4] : memref<1x16xf32, #tpu.memory_space<vmem>>, vector<1x16xf32>
    %4 = vector.broadcast %3 : vector<1x16xf32> to vector<96x16xf32>
    %5 = arith.addf %2, %4 : vector<96x16xf32>
    %cst_5 = arith.constant 0.000000e+00 : f32
    %6 = vector.broadcast %cst_5 : f32 to vector<96x16xf32>
    %7 = arith.maximumf %5, %6 : vector<96x16xf32>
    %c0_6 = arith.constant 0 : index
    %c0_7 = arith.constant 0 : index
    %8 = vector.load %arg4[%c0_6, %c0_7] : memref<96x16xf32, #tpu.memory_space<vmem>>, vector<96x16xf32>
    tpu.vector_store %arg4[%c0_6, %c0_7], %7 {strides = array<i32>} : memref<96x16xf32, #tpu.memory_space<vmem>>, vector<96x16xf32>,
    return
  }
  func.func @transform_0(%arg0: i32) -> (i32, i32) {
    %c0_i32 = arith.constant 0 : i32
    %c0_i32_0 = arith.constant 0 : i32
    return %arg0, %c0_i32 : i32, i32
  }
  func.func @transform_1(%arg0: i32) -> (i32, i32) {
    %c0_i32 = arith.constant 0 : i32
    %c0_i32_0 = arith.constant 0 : i32
    %c0_i32_1 = arith.constant 0 : i32
    return %c0_i32, %c0_i32_0 : i32, i32
  }
  func.func @transform_2(%arg0: i32) -> (i32, i32) {
    %c0_i32 = arith.constant 0 : i32
    %c0_i32_0 = arith.constant 0 : i32
    %c0_i32_1 = arith.constant 0 : i32
    return %c0_i32, %c0_i32_0 : i32, i32
  }
  func.func @transform_3(%arg0: i32) -> (i32, i32) {
    %c0_i32 = arith.constant 0 : i32
    %c0_i32_0 = arith.constant 0 : i32
    return %arg0, %c0_i32 : i32, i32
  }
}

module attributes {stable_mosaic.version = 11 : i64} {
  func.func @_stsgcl_kernel(%arg0: i32, %arg1: i32, %arg2: memref<1x48x16xf32, #tpu.memory_space<vmem>>, %arg3: memref<48x16xf32, #tpu.memory_space<vmem>>, %arg4: memref<24x24xf32, #tpu.memory_space<vmem>>, %arg5: memref<1x16x32xf32, #tpu.memory_space<vmem>>, %arg6: memref<1x1x32xf32, #tpu.memory_space<vmem>>, %arg7: memref<1x16x32xf32, #tpu.memory_space<vmem>>, %arg8: memref<1x1x32xf32, #tpu.memory_space<vmem>>, %arg9: memref<16x16xf32, #tpu.memory_space<vmem>>, %arg10: memref<16x16xf32, #tpu.memory_space<vmem>>, %arg11: memref<1x16xf32, #tpu.memory_space<vmem>>, %arg12: memref<1x1x8x16xf32, #tpu.memory_space<vmem>>) attributes {dimension_semantics = [#tpu.dimension_semantics<parallel>, #tpu.dimension_semantics<parallel>], iteration_bounds = array<i64: 2, 4>, scalar_prefetch = 0 : i64, scratch_operands = 0 : i64, tpu.core_type = #tpu.core_type<tc>, window_params = [{transform_indices = @transform_0, window_bounds = array<i64: 1, 48, 16>}, {pipeline_mode = #tpu.pipeline_mode<synchronous>, transform_indices = @transform_1, window_bounds = array<i64: 48, 16>}, {pipeline_mode = #tpu.pipeline_mode<synchronous>, transform_indices = @transform_2, window_bounds = array<i64: 24, 24>}, {transform_indices = @transform_3, window_bounds = array<i64: 1, 16, 32>}, {transform_indices = @transform_4, window_bounds = array<i64: 1, 1, 32>}, {transform_indices = @transform_5, window_bounds = array<i64: 1, 16, 32>}, {transform_indices = @transform_6, window_bounds = array<i64: 1, 1, 32>}, {pipeline_mode = #tpu.pipeline_mode<synchronous>, transform_indices = @transform_7, window_bounds = array<i64: 16, 16>}, {pipeline_mode = #tpu.pipeline_mode<synchronous>, transform_indices = @transform_8, window_bounds = array<i64: 16, 16>}, {pipeline_mode = #tpu.pipeline_mode<synchronous>, transform_indices = @transform_9, window_bounds = array<i64: 1, 16>}, {transform_indices = @transform_10, window_bounds = array<i64: 1, 1, 8, 16>}]} {
    %c8_i32 = arith.constant 8 : i32
    %0 = arith.muli %arg1, %c8_i32 : i32
    %1 = tpu.assume_multiple %0, 8 : i32
    %c0 = arith.constant 0 : index
    %2 = arith.index_cast %1 : i32 to index
    %c0_0 = arith.constant 0 : index
    %3 = vector.load %arg2[%c0, %2, %c0_0] : memref<1x48x16xf32, #tpu.memory_space<vmem>>, vector<1x24x16xf32>
    %4 = vector.shape_cast %3 : vector<1x24x16xf32> to vector<24x16xf32>
    %5 = arith.index_cast %1 : i32 to index
    %c0_1 = arith.constant 0 : index
    %6 = vector.load %arg3[%5, %c0_1] : memref<48x16xf32, #tpu.memory_space<vmem>>, vector<24x16xf32>
    %7 = arith.addf %4, %6 : vector<24x16xf32>
    %8 = vector.extract_strided_slice %7 {offsets = [0, 0], sizes = [8, 16], strides = [1, 1]} : vector<24x16xf32> to vector<8x16xf32>
    %c0_2 = arith.constant 0 : index
    %c0_3 = arith.constant 0 : index
    %9 = vector.load %arg9[%c0_2, %c0_3] : memref<16x16xf32, #tpu.memory_space<vmem>>, vector<16x16xf32>
    %cst = arith.constant dense<0.000000e+00> : vector<8x16xf32>
    %10 = tpu.matmul %8, %9, %cst {dimension_numbers = #tpu.dot_dimension_numbers<[1], [0], [0], [1], [0, 0, 1, 1], [], []>} : vector<8x16xf32>, vector<16x16xf32>, vector<8x16xf32> -> vector<8x16xf32>
    %11 = vector.extract_strided_slice %7 {offsets = [16, 0], sizes = [8, 16], strides = [1, 1]} : vector<24x16xf32> to vector<8x16xf32>
    %c0_4 = arith.constant 0 : index
    %c0_5 = arith.constant 0 : index
    %12 = vector.load %arg10[%c0_4, %c0_5] : memref<16x16xf32, #tpu.memory_space<vmem>>, vector<16x16xf32>
    %cst_6 = arith.constant dense<0.000000e+00> : vector<8x16xf32>
    %13 = tpu.matmul %11, %12, %cst_6 {dimension_numbers = #tpu.dot_dimension_numbers<[1], [0], [0], [1], [0, 0, 1, 1], [], []>} : vector<8x16xf32>, vector<16x16xf32>, vector<8x16xf32> -> vector<8x16xf32>
    %14 = arith.addf %10, %13 : vector<8x16xf32>
    %c0_7 = arith.constant 0 : index
    %c0_8 = arith.constant 0 : index
    %15 = vector.load %arg11[%c0_7, %c0_8] : memref<1x16xf32, #tpu.memory_space<vmem>>, vector<1x16xf32>
    %16 = vector.broadcast %15 : vector<1x16xf32> to vector<8x16xf32>
    %17 = arith.addf %14, %16 : vector<8x16xf32>
    %c0_9 = arith.constant 0 : index
    %c0_10 = arith.constant 0 : index
    %18 = vector.load %arg4[%c0_9, %c0_10] : memref<24x24xf32, #tpu.memory_space<vmem>>, vector<24x24xf32>
    %c0_11 = arith.constant 0 : index
    %c0_12 = arith.constant 0 : index
    %c0_13 = arith.constant 0 : index
    %19 = vector.load %arg5[%c0_11, %c0_12, %c0_13] : memref<1x16x32xf32, #tpu.memory_space<vmem>>, vector<1x16x32xf32>
    %20 = vector.shape_cast %19 : vector<1x16x32xf32> to vector<16x32xf32>
    %c0_14 = arith.constant 0 : index
    %c0_15 = arith.constant 0 : index
    %c0_16 = arith.constant 0 : index
    %21 = vector.load %arg6[%c0_14, %c0_15, %c0_16] : memref<1x1x32xf32, #tpu.memory_space<vmem>>, vector<1x1x32xf32>
    %22 = vector.shape_cast %21 : vector<1x1x32xf32> to vector<1x32xf32>
    %cst_17 = arith.constant dense<0.000000e+00> : vector<24x16xf32>
    %23 = tpu.matmul %18, %7, %cst_17 {dimension_numbers = #tpu.dot_dimension_numbers<[1], [0], [0], [1], [0, 0, 1, 1], [], []>} : vector<24x24xf32>, vector<24x16xf32>, vector<24x16xf32> -> vector<24x16xf32>
    %cst_18 = arith.constant dense<0.000000e+00> : vector<24x32xf32>
    %24 = tpu.matmul %23, %20, %cst_18 {dimension_numbers = #tpu.dot_dimension_numbers<[1], [0], [0], [1], [0, 0, 1, 1], [], []>} : vector<24x16xf32>, vector<16x32xf32>, vector<24x32xf32> -> vector<24x32xf32>
    %25 = vector.broadcast %22 : vector<1x32xf32> to vector<24x32xf32>
    %26 = arith.addf %24, %25 : vector<24x32xf32>
    %27 = vector.extract_strided_slice %26 {offsets = [0, 16], sizes = [24, 16], strides = [1, 1]} : vector<24x32xf32> to vector<24x16xf32>
    %cst_19 = arith.constant 0.000000e+00 : f32
    %28 = vector.broadcast %cst_19 : f32 to vector<24x16xf32>
    %29 = arith.subf %28, %27 : vector<24x16xf32>
    %30 = math.exp %29 : vector<24x16xf32>
    %cst_20 = arith.constant 1.000000e+00 : f32
    %31 = vector.broadcast %cst_20 : f32 to vector<24x16xf32>
    %32 = arith.addf %31, %30 : vector<24x16xf32>
    %33 = tpu.reciprocal %32 {approx = true} : vector<24x16xf32> -> vector<24x16xf32>
    %34 = vector.extract_strided_slice %26 {offsets = [0, 0], sizes = [24, 16], strides = [1, 1]} : vector<24x32xf32> to vector<24x16xf32>
    %35 = arith.mulf %34, %33 : vector<24x16xf32>
    %36 = vector.extract_strided_slice %35 {offsets = [8, 0], sizes = [8, 16], strides = [1, 1]} : vector<24x16xf32> to vector<8x16xf32>
    %c0_21 = arith.constant 0 : index
    %c0_22 = arith.constant 0 : index
    %c0_23 = arith.constant 0 : index
    %37 = vector.load %arg7[%c0_21, %c0_22, %c0_23] : memref<1x16x32xf32, #tpu.memory_space<vmem>>, vector<1x16x32xf32>
    %38 = vector.shape_cast %37 : vector<1x16x32xf32> to vector<16x32xf32>
    %c0_24 = arith.constant 0 : index
    %c0_25 = arith.constant 0 : index
    %c0_26 = arith.constant 0 : index
    %39 = vector.load %arg8[%c0_24, %c0_25, %c0_26] : memref<1x1x32xf32, #tpu.memory_space<vmem>>, vector<1x1x32xf32>
    %40 = vector.shape_cast %39 : vector<1x1x32xf32> to vector<1x32xf32>
    %cst_27 = arith.constant dense<0.000000e+00> : vector<24x16xf32>
    %41 = tpu.matmul %18, %35, %cst_27 {dimension_numbers = #tpu.dot_dimension_numbers<[1], [0], [0], [1], [0, 0, 1, 1], [], []>} : vector<24x24xf32>, vector<24x16xf32>, vector<24x16xf32> -> vector<24x16xf32>
    %cst_28 = arith.constant dense<0.000000e+00> : vector<24x32xf32>
    %42 = tpu.matmul %41, %38, %cst_28 {dimension_numbers = #tpu.dot_dimension_numbers<[1], [0], [0], [1], [0, 0, 1, 1], [], []>} : vector<24x16xf32>, vector<16x32xf32>, vector<24x32xf32> -> vector<24x32xf32>
    %43 = vector.broadcast %40 : vector<1x32xf32> to vector<24x32xf32>
    %44 = arith.addf %42, %43 : vector<24x32xf32>
    %45 = vector.extract_strided_slice %44 {offsets = [0, 16], sizes = [24, 16], strides = [1, 1]} : vector<24x32xf32> to vector<24x16xf32>
    %cst_29 = arith.constant 0.000000e+00 : f32
    %46 = vector.broadcast %cst_29 : f32 to vector<24x16xf32>
    %47 = arith.subf %46, %45 : vector<24x16xf32>
    %48 = math.exp %47 : vector<24x16xf32>
    %cst_30 = arith.constant 1.000000e+00 : f32
    %49 = vector.broadcast %cst_30 : f32 to vector<24x16xf32>
    %50 = arith.addf %49, %48 : vector<24x16xf32>
    %51 = tpu.reciprocal %50 {approx = true} : vector<24x16xf32> -> vector<24x16xf32>
    %52 = vector.extract_strided_slice %44 {offsets = [0, 0], sizes = [24, 16], strides = [1, 1]} : vector<24x32xf32> to vector<24x16xf32>
    %53 = arith.mulf %52, %51 : vector<24x16xf32>
    %54 = vector.extract_strided_slice %53 {offsets = [8, 0], sizes = [8, 16], strides = [1, 1]} : vector<24x16xf32> to vector<8x16xf32>
    %55 = arith.maximumf %36, %54 : vector<8x16xf32>
    %56 = arith.addf %55, %17 : vector<8x16xf32>
    %c0_31 = arith.constant 0 : index
    %c0_32 = arith.constant 0 : index
    %c0_33 = arith.constant 0 : index
    %c0_34 = arith.constant 0 : index
    %57 = vector.load %arg12[%c0_31, %c0_32, %c0_33, %c0_34] : memref<1x1x8x16xf32, #tpu.memory_space<vmem>>, vector<1x1x8x16xf32>
    %58 = vector.shape_cast %57 : vector<1x1x8x16xf32> to vector<8x16xf32>
    %59 = vector.shape_cast %56 : vector<8x16xf32> to vector<1x1x8x16xf32>
    tpu.vector_store %arg12[%c0_31, %c0_32, %c0_33, %c0_34], %59 {strides = array<i32>} : memref<1x1x8x16xf32, #tpu.memory_space<vmem>>, vector<1x1x8x16xf32>,
    return
  }
  func.func @transform_0(%arg0: i32, %arg1: i32) -> (i32, i32, i32) {
    %c0_i32 = arith.constant 0 : i32
    %c0_i32_0 = arith.constant 0 : i32
    %c0_i32_1 = arith.constant 0 : i32
    return %arg0, %c0_i32, %c0_i32_0 : i32, i32, i32
  }
  func.func @transform_1(%arg0: i32, %arg1: i32) -> (i32, i32) {
    %c0_i32 = arith.constant 0 : i32
    %c0_i32_0 = arith.constant 0 : i32
    %c0_i32_1 = arith.constant 0 : i32
    return %c0_i32, %c0_i32_0 : i32, i32
  }
  func.func @transform_2(%arg0: i32, %arg1: i32) -> (i32, i32) {
    %c0_i32 = arith.constant 0 : i32
    %c0_i32_0 = arith.constant 0 : i32
    %c0_i32_1 = arith.constant 0 : i32
    return %c0_i32, %c0_i32_0 : i32, i32
  }
  func.func @transform_3(%arg0: i32, %arg1: i32) -> (i32, i32, i32) {
    %c0_i32 = arith.constant 0 : i32
    %c0_i32_0 = arith.constant 0 : i32
    %c0_i32_1 = arith.constant 0 : i32
    return %arg1, %c0_i32, %c0_i32_0 : i32, i32, i32
  }
  func.func @transform_4(%arg0: i32, %arg1: i32) -> (i32, i32, i32) {
    %c0_i32 = arith.constant 0 : i32
    %c0_i32_0 = arith.constant 0 : i32
    %c0_i32_1 = arith.constant 0 : i32
    return %arg1, %c0_i32, %c0_i32_0 : i32, i32, i32
  }
  func.func @transform_5(%arg0: i32, %arg1: i32) -> (i32, i32, i32) {
    %c0_i32 = arith.constant 0 : i32
    %c0_i32_0 = arith.constant 0 : i32
    %c0_i32_1 = arith.constant 0 : i32
    return %arg1, %c0_i32, %c0_i32_0 : i32, i32, i32
  }
  func.func @transform_6(%arg0: i32, %arg1: i32) -> (i32, i32, i32) {
    %c0_i32 = arith.constant 0 : i32
    %c0_i32_0 = arith.constant 0 : i32
    %c0_i32_1 = arith.constant 0 : i32
    return %arg1, %c0_i32, %c0_i32_0 : i32, i32, i32
  }
  func.func @transform_7(%arg0: i32, %arg1: i32) -> (i32, i32) {
    %c0_i32 = arith.constant 0 : i32
    %c0_i32_0 = arith.constant 0 : i32
    %c0_i32_1 = arith.constant 0 : i32
    return %c0_i32, %c0_i32_0 : i32, i32
  }
  func.func @transform_8(%arg0: i32, %arg1: i32) -> (i32, i32) {
    %c0_i32 = arith.constant 0 : i32
    %c0_i32_0 = arith.constant 0 : i32
    %c0_i32_1 = arith.constant 0 : i32
    return %c0_i32, %c0_i32_0 : i32, i32
  }
  func.func @transform_9(%arg0: i32, %arg1: i32) -> (i32, i32) {
    %c0_i32 = arith.constant 0 : i32
    %c0_i32_0 = arith.constant 0 : i32
    %c0_i32_1 = arith.constant 0 : i32
    return %c0_i32, %c0_i32_0 : i32, i32
  }
  func.func @transform_10(%arg0: i32, %arg1: i32) -> (i32, i32, i32, i32) {
    %c0_i32 = arith.constant 0 : i32
    %c0_i32_0 = arith.constant 0 : i32
    %c0_i32_1 = arith.constant 0 : i32
    return %arg0, %arg1, %c0_i32, %c0_i32_0 : i32, i32, i32, i32
  }
}

module attributes {stable_mosaic.version = 11 : i64} {
  func.func @_stsgcl_kernel(%arg0: i32, %arg1: i32, %arg2: memref<1x32x16xf32, #tpu.memory_space<vmem>>, %arg3: memref<32x16xf32, #tpu.memory_space<vmem>>, %arg4: memref<24x24xf32, #tpu.memory_space<vmem>>, %arg5: memref<1x16x32xf32, #tpu.memory_space<vmem>>, %arg6: memref<1x1x32xf32, #tpu.memory_space<vmem>>, %arg7: memref<1x16x32xf32, #tpu.memory_space<vmem>>, %arg8: memref<1x1x32xf32, #tpu.memory_space<vmem>>, %arg9: memref<16x16xf32, #tpu.memory_space<vmem>>, %arg10: memref<16x16xf32, #tpu.memory_space<vmem>>, %arg11: memref<1x16xf32, #tpu.memory_space<vmem>>, %arg12: memref<1x1x8x16xf32, #tpu.memory_space<vmem>>) attributes {dimension_semantics = [#tpu.dimension_semantics<parallel>, #tpu.dimension_semantics<parallel>], iteration_bounds = array<i64: 2, 2>, scalar_prefetch = 0 : i64, scratch_operands = 0 : i64, tpu.core_type = #tpu.core_type<tc>, window_params = [{transform_indices = @transform_0, window_bounds = array<i64: 1, 32, 16>}, {pipeline_mode = #tpu.pipeline_mode<synchronous>, transform_indices = @transform_1, window_bounds = array<i64: 32, 16>}, {pipeline_mode = #tpu.pipeline_mode<synchronous>, transform_indices = @transform_2, window_bounds = array<i64: 24, 24>}, {transform_indices = @transform_3, window_bounds = array<i64: 1, 16, 32>}, {transform_indices = @transform_4, window_bounds = array<i64: 1, 1, 32>}, {transform_indices = @transform_5, window_bounds = array<i64: 1, 16, 32>}, {transform_indices = @transform_6, window_bounds = array<i64: 1, 1, 32>}, {pipeline_mode = #tpu.pipeline_mode<synchronous>, transform_indices = @transform_7, window_bounds = array<i64: 16, 16>}, {pipeline_mode = #tpu.pipeline_mode<synchronous>, transform_indices = @transform_8, window_bounds = array<i64: 16, 16>}, {pipeline_mode = #tpu.pipeline_mode<synchronous>, transform_indices = @transform_9, window_bounds = array<i64: 1, 16>}, {transform_indices = @transform_10, window_bounds = array<i64: 1, 1, 8, 16>}]} {
    %c8_i32 = arith.constant 8 : i32
    %0 = arith.muli %arg1, %c8_i32 : i32
    %1 = tpu.assume_multiple %0, 8 : i32
    %c0 = arith.constant 0 : index
    %2 = arith.index_cast %1 : i32 to index
    %c0_0 = arith.constant 0 : index
    %3 = vector.load %arg2[%c0, %2, %c0_0] : memref<1x32x16xf32, #tpu.memory_space<vmem>>, vector<1x24x16xf32>
    %4 = vector.shape_cast %3 : vector<1x24x16xf32> to vector<24x16xf32>
    %5 = arith.index_cast %1 : i32 to index
    %c0_1 = arith.constant 0 : index
    %6 = vector.load %arg3[%5, %c0_1] : memref<32x16xf32, #tpu.memory_space<vmem>>, vector<24x16xf32>
    %7 = arith.addf %4, %6 : vector<24x16xf32>
    %8 = vector.extract_strided_slice %7 {offsets = [0, 0], sizes = [8, 16], strides = [1, 1]} : vector<24x16xf32> to vector<8x16xf32>
    %c0_2 = arith.constant 0 : index
    %c0_3 = arith.constant 0 : index
    %9 = vector.load %arg9[%c0_2, %c0_3] : memref<16x16xf32, #tpu.memory_space<vmem>>, vector<16x16xf32>
    %cst = arith.constant dense<0.000000e+00> : vector<8x16xf32>
    %10 = tpu.matmul %8, %9, %cst {dimension_numbers = #tpu.dot_dimension_numbers<[1], [0], [0], [1], [0, 0, 1, 1], [], []>} : vector<8x16xf32>, vector<16x16xf32>, vector<8x16xf32> -> vector<8x16xf32>
    %11 = vector.extract_strided_slice %7 {offsets = [16, 0], sizes = [8, 16], strides = [1, 1]} : vector<24x16xf32> to vector<8x16xf32>
    %c0_4 = arith.constant 0 : index
    %c0_5 = arith.constant 0 : index
    %12 = vector.load %arg10[%c0_4, %c0_5] : memref<16x16xf32, #tpu.memory_space<vmem>>, vector<16x16xf32>
    %cst_6 = arith.constant dense<0.000000e+00> : vector<8x16xf32>
    %13 = tpu.matmul %11, %12, %cst_6 {dimension_numbers = #tpu.dot_dimension_numbers<[1], [0], [0], [1], [0, 0, 1, 1], [], []>} : vector<8x16xf32>, vector<16x16xf32>, vector<8x16xf32> -> vector<8x16xf32>
    %14 = arith.addf %10, %13 : vector<8x16xf32>
    %c0_7 = arith.constant 0 : index
    %c0_8 = arith.constant 0 : index
    %15 = vector.load %arg11[%c0_7, %c0_8] : memref<1x16xf32, #tpu.memory_space<vmem>>, vector<1x16xf32>
    %16 = vector.broadcast %15 : vector<1x16xf32> to vector<8x16xf32>
    %17 = arith.addf %14, %16 : vector<8x16xf32>
    %c0_9 = arith.constant 0 : index
    %c0_10 = arith.constant 0 : index
    %18 = vector.load %arg4[%c0_9, %c0_10] : memref<24x24xf32, #tpu.memory_space<vmem>>, vector<24x24xf32>
    %c0_11 = arith.constant 0 : index
    %c0_12 = arith.constant 0 : index
    %c0_13 = arith.constant 0 : index
    %19 = vector.load %arg5[%c0_11, %c0_12, %c0_13] : memref<1x16x32xf32, #tpu.memory_space<vmem>>, vector<1x16x32xf32>
    %20 = vector.shape_cast %19 : vector<1x16x32xf32> to vector<16x32xf32>
    %c0_14 = arith.constant 0 : index
    %c0_15 = arith.constant 0 : index
    %c0_16 = arith.constant 0 : index
    %21 = vector.load %arg6[%c0_14, %c0_15, %c0_16] : memref<1x1x32xf32, #tpu.memory_space<vmem>>, vector<1x1x32xf32>
    %22 = vector.shape_cast %21 : vector<1x1x32xf32> to vector<1x32xf32>
    %cst_17 = arith.constant dense<0.000000e+00> : vector<24x16xf32>
    %23 = tpu.matmul %18, %7, %cst_17 {dimension_numbers = #tpu.dot_dimension_numbers<[1], [0], [0], [1], [0, 0, 1, 1], [], []>} : vector<24x24xf32>, vector<24x16xf32>, vector<24x16xf32> -> vector<24x16xf32>
    %cst_18 = arith.constant dense<0.000000e+00> : vector<24x32xf32>
    %24 = tpu.matmul %23, %20, %cst_18 {dimension_numbers = #tpu.dot_dimension_numbers<[1], [0], [0], [1], [0, 0, 1, 1], [], []>} : vector<24x16xf32>, vector<16x32xf32>, vector<24x32xf32> -> vector<24x32xf32>
    %25 = vector.broadcast %22 : vector<1x32xf32> to vector<24x32xf32>
    %26 = arith.addf %24, %25 : vector<24x32xf32>
    %27 = vector.extract_strided_slice %26 {offsets = [0, 16], sizes = [24, 16], strides = [1, 1]} : vector<24x32xf32> to vector<24x16xf32>
    %cst_19 = arith.constant 0.000000e+00 : f32
    %28 = vector.broadcast %cst_19 : f32 to vector<24x16xf32>
    %29 = arith.subf %28, %27 : vector<24x16xf32>
    %30 = math.exp %29 : vector<24x16xf32>
    %cst_20 = arith.constant 1.000000e+00 : f32
    %31 = vector.broadcast %cst_20 : f32 to vector<24x16xf32>
    %32 = arith.addf %31, %30 : vector<24x16xf32>
    %33 = tpu.reciprocal %32 {approx = true} : vector<24x16xf32> -> vector<24x16xf32>
    %34 = vector.extract_strided_slice %26 {offsets = [0, 0], sizes = [24, 16], strides = [1, 1]} : vector<24x32xf32> to vector<24x16xf32>
    %35 = arith.mulf %34, %33 : vector<24x16xf32>
    %36 = vector.extract_strided_slice %35 {offsets = [8, 0], sizes = [8, 16], strides = [1, 1]} : vector<24x16xf32> to vector<8x16xf32>
    %c0_21 = arith.constant 0 : index
    %c0_22 = arith.constant 0 : index
    %c0_23 = arith.constant 0 : index
    %37 = vector.load %arg7[%c0_21, %c0_22, %c0_23] : memref<1x16x32xf32, #tpu.memory_space<vmem>>, vector<1x16x32xf32>
    %38 = vector.shape_cast %37 : vector<1x16x32xf32> to vector<16x32xf32>
    %c0_24 = arith.constant 0 : index
    %c0_25 = arith.constant 0 : index
    %c0_26 = arith.constant 0 : index
    %39 = vector.load %arg8[%c0_24, %c0_25, %c0_26] : memref<1x1x32xf32, #tpu.memory_space<vmem>>, vector<1x1x32xf32>
    %40 = vector.shape_cast %39 : vector<1x1x32xf32> to vector<1x32xf32>
    %cst_27 = arith.constant dense<0.000000e+00> : vector<24x16xf32>
    %41 = tpu.matmul %18, %35, %cst_27 {dimension_numbers = #tpu.dot_dimension_numbers<[1], [0], [0], [1], [0, 0, 1, 1], [], []>} : vector<24x24xf32>, vector<24x16xf32>, vector<24x16xf32> -> vector<24x16xf32>
    %cst_28 = arith.constant dense<0.000000e+00> : vector<24x32xf32>
    %42 = tpu.matmul %41, %38, %cst_28 {dimension_numbers = #tpu.dot_dimension_numbers<[1], [0], [0], [1], [0, 0, 1, 1], [], []>} : vector<24x16xf32>, vector<16x32xf32>, vector<24x32xf32> -> vector<24x32xf32>
    %43 = vector.broadcast %40 : vector<1x32xf32> to vector<24x32xf32>
    %44 = arith.addf %42, %43 : vector<24x32xf32>
    %45 = vector.extract_strided_slice %44 {offsets = [0, 16], sizes = [24, 16], strides = [1, 1]} : vector<24x32xf32> to vector<24x16xf32>
    %cst_29 = arith.constant 0.000000e+00 : f32
    %46 = vector.broadcast %cst_29 : f32 to vector<24x16xf32>
    %47 = arith.subf %46, %45 : vector<24x16xf32>
    %48 = math.exp %47 : vector<24x16xf32>
    %cst_30 = arith.constant 1.000000e+00 : f32
    %49 = vector.broadcast %cst_30 : f32 to vector<24x16xf32>
    %50 = arith.addf %49, %48 : vector<24x16xf32>
    %51 = tpu.reciprocal %50 {approx = true} : vector<24x16xf32> -> vector<24x16xf32>
    %52 = vector.extract_strided_slice %44 {offsets = [0, 0], sizes = [24, 16], strides = [1, 1]} : vector<24x32xf32> to vector<24x16xf32>
    %53 = arith.mulf %52, %51 : vector<24x16xf32>
    %54 = vector.extract_strided_slice %53 {offsets = [8, 0], sizes = [8, 16], strides = [1, 1]} : vector<24x16xf32> to vector<8x16xf32>
    %55 = arith.maximumf %36, %54 : vector<8x16xf32>
    %56 = arith.addf %55, %17 : vector<8x16xf32>
    %c0_31 = arith.constant 0 : index
    %c0_32 = arith.constant 0 : index
    %c0_33 = arith.constant 0 : index
    %c0_34 = arith.constant 0 : index
    %57 = vector.load %arg12[%c0_31, %c0_32, %c0_33, %c0_34] : memref<1x1x8x16xf32, #tpu.memory_space<vmem>>, vector<1x1x8x16xf32>
    %58 = vector.shape_cast %57 : vector<1x1x8x16xf32> to vector<8x16xf32>
    %59 = vector.shape_cast %56 : vector<8x16xf32> to vector<1x1x8x16xf32>
    tpu.vector_store %arg12[%c0_31, %c0_32, %c0_33, %c0_34], %59 {strides = array<i32>} : memref<1x1x8x16xf32, #tpu.memory_space<vmem>>, vector<1x1x8x16xf32>,
    return
  }
  func.func @transform_0(%arg0: i32, %arg1: i32) -> (i32, i32, i32) {
    %c0_i32 = arith.constant 0 : i32
    %c0_i32_0 = arith.constant 0 : i32
    %c0_i32_1 = arith.constant 0 : i32
    return %arg0, %c0_i32, %c0_i32_0 : i32, i32, i32
  }
  func.func @transform_1(%arg0: i32, %arg1: i32) -> (i32, i32) {
    %c0_i32 = arith.constant 0 : i32
    %c0_i32_0 = arith.constant 0 : i32
    %c0_i32_1 = arith.constant 0 : i32
    return %c0_i32, %c0_i32_0 : i32, i32
  }
  func.func @transform_2(%arg0: i32, %arg1: i32) -> (i32, i32) {
    %c0_i32 = arith.constant 0 : i32
    %c0_i32_0 = arith.constant 0 : i32
    %c0_i32_1 = arith.constant 0 : i32
    return %c0_i32, %c0_i32_0 : i32, i32
  }
  func.func @transform_3(%arg0: i32, %arg1: i32) -> (i32, i32, i32) {
    %c0_i32 = arith.constant 0 : i32
    %c0_i32_0 = arith.constant 0 : i32
    %c0_i32_1 = arith.constant 0 : i32
    return %arg1, %c0_i32, %c0_i32_0 : i32, i32, i32
  }
  func.func @transform_4(%arg0: i32, %arg1: i32) -> (i32, i32, i32) {
    %c0_i32 = arith.constant 0 : i32
    %c0_i32_0 = arith.constant 0 : i32
    %c0_i32_1 = arith.constant 0 : i32
    return %arg1, %c0_i32, %c0_i32_0 : i32, i32, i32
  }
  func.func @transform_5(%arg0: i32, %arg1: i32) -> (i32, i32, i32) {
    %c0_i32 = arith.constant 0 : i32
    %c0_i32_0 = arith.constant 0 : i32
    %c0_i32_1 = arith.constant 0 : i32
    return %arg1, %c0_i32, %c0_i32_0 : i32, i32, i32
  }
  func.func @transform_6(%arg0: i32, %arg1: i32) -> (i32, i32, i32) {
    %c0_i32 = arith.constant 0 : i32
    %c0_i32_0 = arith.constant 0 : i32
    %c0_i32_1 = arith.constant 0 : i32
    return %arg1, %c0_i32, %c0_i32_0 : i32, i32, i32
  }
  func.func @transform_7(%arg0: i32, %arg1: i32) -> (i32, i32) {
    %c0_i32 = arith.constant 0 : i32
    %c0_i32_0 = arith.constant 0 : i32
    %c0_i32_1 = arith.constant 0 : i32
    return %c0_i32, %c0_i32_0 : i32, i32
  }
  func.func @transform_8(%arg0: i32, %arg1: i32) -> (i32, i32) {
    %c0_i32 = arith.constant 0 : i32
    %c0_i32_0 = arith.constant 0 : i32
    %c0_i32_1 = arith.constant 0 : i32
    return %c0_i32, %c0_i32_0 : i32, i32
  }
  func.func @transform_9(%arg0: i32, %arg1: i32) -> (i32, i32) {
    %c0_i32 = arith.constant 0 : i32
    %c0_i32_0 = arith.constant 0 : i32
    %c0_i32_1 = arith.constant 0 : i32
    return %c0_i32, %c0_i32_0 : i32, i32
  }
  func.func @transform_10(%arg0: i32, %arg1: i32) -> (i32, i32, i32, i32) {
    %c0_i32 = arith.constant 0 : i32
    %c0_i32_0 = arith.constant 0 : i32
    %c0_i32_1 = arith.constant 0 : i32
    return %arg0, %arg1, %c0_i32, %c0_i32_0 : i32, i32, i32, i32
  }
}

module attributes {stable_mosaic.version = 11 : i64} {
  func.func @_predict_kernel(%arg0: i32, %arg1: memref<16x32xf32, #tpu.memory_space<vmem>>, %arg2: memref<32x96xf32, #tpu.memory_space<vmem>>, %arg3: memref<1x96xf32, #tpu.memory_space<vmem>>, %arg4: memref<96x3xf32, #tpu.memory_space<vmem>>, %arg5: memref<1x3xf32, #tpu.memory_space<vmem>>, %arg6: memref<16x3xf32, #tpu.memory_space<vmem>>) attributes {dimension_semantics = [#tpu.dimension_semantics<parallel>], iteration_bounds = array<i64: 1>, scalar_prefetch = 0 : i64, scratch_operands = 0 : i64, tpu.core_type = #tpu.core_type<tc>, window_params = [{transform_indices = @transform_0, window_bounds = array<i64: 16, 32>}, {pipeline_mode = #tpu.pipeline_mode<synchronous>, transform_indices = @transform_1, window_bounds = array<i64: 32, 96>}, {pipeline_mode = #tpu.pipeline_mode<synchronous>, transform_indices = @transform_2, window_bounds = array<i64: 1, 96>}, {pipeline_mode = #tpu.pipeline_mode<synchronous>, transform_indices = @transform_3, window_bounds = array<i64: 96, 3>}, {pipeline_mode = #tpu.pipeline_mode<synchronous>, transform_indices = @transform_4, window_bounds = array<i64: 1, 3>}, {transform_indices = @transform_5, window_bounds = array<i64: 16, 3>}]} {
    %c0 = arith.constant 0 : index
    %c0_0 = arith.constant 0 : index
    %0 = vector.load %arg1[%c0, %c0_0] : memref<16x32xf32, #tpu.memory_space<vmem>>, vector<16x32xf32>
    %c0_1 = arith.constant 0 : index
    %c0_2 = arith.constant 0 : index
    %1 = vector.load %arg2[%c0_1, %c0_2] : memref<32x96xf32, #tpu.memory_space<vmem>>, vector<32x96xf32>
    %cst = arith.constant dense<0.000000e+00> : vector<16x96xf32>
    %2 = tpu.matmul %0, %1, %cst {dimension_numbers = #tpu.dot_dimension_numbers<[1], [0], [0], [1], [0, 0, 1, 1], [], []>} : vector<16x32xf32>, vector<32x96xf32>, vector<16x96xf32> -> vector<16x96xf32>
    %c0_3 = arith.constant 0 : index
    %c0_4 = arith.constant 0 : index
    %3 = vector.load %arg3[%c0_3, %c0_4] : memref<1x96xf32, #tpu.memory_space<vmem>>, vector<1x96xf32>
    %4 = vector.broadcast %3 : vector<1x96xf32> to vector<16x96xf32>
    %5 = arith.addf %2, %4 : vector<16x96xf32>
    %cst_5 = arith.constant 0.000000e+00 : f32
    %6 = vector.broadcast %cst_5 : f32 to vector<16x96xf32>
    %7 = arith.maximumf %5, %6 : vector<16x96xf32>
    %c0_6 = arith.constant 0 : index
    %c0_7 = arith.constant 0 : index
    %8 = vector.load %arg4[%c0_6, %c0_7] : memref<96x3xf32, #tpu.memory_space<vmem>>, vector<96x3xf32>
    %cst_8 = arith.constant dense<0.000000e+00> : vector<16x3xf32>
    %9 = tpu.matmul %7, %8, %cst_8 {dimension_numbers = #tpu.dot_dimension_numbers<[1], [0], [0], [1], [0, 0, 1, 1], [], []>} : vector<16x96xf32>, vector<96x3xf32>, vector<16x3xf32> -> vector<16x3xf32>
    %c0_9 = arith.constant 0 : index
    %c0_10 = arith.constant 0 : index
    %10 = vector.load %arg5[%c0_9, %c0_10] : memref<1x3xf32, #tpu.memory_space<vmem>>, vector<1x3xf32>
    %11 = vector.broadcast %10 : vector<1x3xf32> to vector<16x3xf32>
    %12 = arith.addf %9, %11 : vector<16x3xf32>
    %c0_11 = arith.constant 0 : index
    %c0_12 = arith.constant 0 : index
    %13 = vector.load %arg6[%c0_11, %c0_12] : memref<16x3xf32, #tpu.memory_space<vmem>>, vector<16x3xf32>
    tpu.vector_store %arg6[%c0_11, %c0_12], %12 {strides = array<i32>} : memref<16x3xf32, #tpu.memory_space<vmem>>, vector<16x3xf32>,
    return
  }
  func.func @transform_0(%arg0: i32) -> (i32, i32) {
    %c0_i32 = arith.constant 0 : i32
    %c0_i32_0 = arith.constant 0 : i32
    return %arg0, %c0_i32 : i32, i32
  }
  func.func @transform_1(%arg0: i32) -> (i32, i32) {
    %c0_i32 = arith.constant 0 : i32
    %c0_i32_0 = arith.constant 0 : i32
    %c0_i32_1 = arith.constant 0 : i32
    return %c0_i32, %c0_i32_0 : i32, i32
  }
  func.func @transform_2(%arg0: i32) -> (i32, i32) {
    %c0_i32 = arith.constant 0 : i32
    %c0_i32_0 = arith.constant 0 : i32
    %c0_i32_1 = arith.constant 0 : i32
    return %c0_i32, %c0_i32_0 : i32, i32
  }
  func.func @transform_3(%arg0: i32) -> (i32, i32) {
    %c0_i32 = arith.constant 0 : i32
    %c0_i32_0 = arith.constant 0 : i32
    %c0_i32_1 = arith.constant 0 : i32
    return %c0_i32, %c0_i32_0 : i32, i32
  }
  func.func @transform_4(%arg0: i32) -> (i32, i32) {
    %c0_i32 = arith.constant 0 : i32
    %c0_i32_0 = arith.constant 0 : i32
    %c0_i32_1 = arith.constant 0 : i32
    return %c0_i32, %c0_i32_0 : i32, i32
  }
  func.func @transform_5(%arg0: i32) -> (i32, i32) {
    %c0_i32 = arith.constant 0 : i32
    %c0_i32_0 = arith.constant 0 : i32
    return %arg0, %c0_i32 : i32, i32
  }
}

</mosaic_0001>

<bundles_post_ra>
// kernel: mul.1
= control target key start
LH: loop header
LB: loop body
LE: loop exit
PB: predicated region body
PF: predicated region fallthrough
CT: control target
= control target key end

     0   :  { %3 = vsyncpa [#allocation1], 0  ;;  %s78_s11 = smov [#allocation0]   ;;  %s79_s13 = smov 128   ;;  %s117_s0 = inlined_call_operand.vmem [shape: f32[24,24], index: 0, kind: input, shape index: {}]   ;;  %s118_s1 = inlined_call_operand.hbm [shape: f32[24,24], index: 1, kind: input, shape index: {}]   ;;  %s119_s2 = inlined_call_operand.vmem [shape: f32[24,24], index: 2, kind: output, shape index: {}]  }
   0x1   :  { %s6_s1 = sshll.u32 %s118_s1, 4  ;;  %s8_s12 = sshll.u32 %s78_s11, 4  ;;  %s7_s1 = int_to_ptr.hbm [resolvable:$true] %s6_s1  ;;  %s9_s12 = int_to_ptr.vmem [resolvable:$true] %s8_s12 }
   0x2   :  { %s80_s14 = smov 8  }
   0x3   :  { %14 = dma.hbm_to_vmem [thread:$0]  %s7_s1, 384, %s9_s12, [#allocation1], %s79_s13, %s79_s13, %s80_s14  }
   0x4   :  { %76 = dma.done.wait [#allocation1], 384  }
   0x5   :  { %77 = vsyncadd [#allocation1], 4294966912  ;;  %v17_v0 = vld [vmem:[%s117_s0] sm:$0xff]  ;;  %v45_v2 = vld [vmem:[%s117_s0 + $0x8] sm:$0xff] }
   0x6   :  { %v18_v1 = vld [vmem:[#allocation0] sm:$0xff]  ;;  %v27_v4 = vld [vmem:[#allocation0 + $0x8] sm:$0xff]  ;;  %v47_v5 = vld [vmem:[%s117_s0 + $0x10] sm:$0xff] }
   0x7   :  { %v21_v3 = vmul.f32 %v18_v1, %v17_v0  ;;  %v37_v6 = vld [vmem:[#allocation0 + $0x10] sm:$0xff]  ;;  %v30_v7 = vmul.f32 %v45_v2, %v27_v4 }
   0x8   :  { %v40_v8 = vmul.f32 %v47_v5, %v37_v6 }
   0x9   :  { %23 = vst [vmem:[%s119_s2] sm:$0xff] %v21_v3 }
   0xa   :  { %46 = vst [vmem:[%s119_s2 + $0x8] sm:$0xff] %v30_v7 }
   0xb   :  { %48 = vst [vmem:[%s119_s2 + $0x10] sm:$0xff] %v40_v8 }
   0xc   :  { %44 = vsyncpa [#allocation1], 1 }

// kernel: stsgcn_forward.4
= control target key start
LH: loop header
LB: loop body
LE: loop exit
PB: predicated region body
PF: predicated region fallthrough
CT: control target
= control target key end

     0   :  { %vm68_vm0 = vcmask 1041408   ;;  %vm31_vm1 = vcmask 15360   ;;  %vm137_vm2 = vcmask 130048   ;;  %s293_s1 = inlined_call_operand.vmem [shape: f32[2,16], index: 1, kind: input, shape index: {}]   ;;  %s294_s0 = inlined_call_operand.vmem [shape: f32[96,2], index: 0, kind: input, shape index: {}]   ;;  %s295_s2 = inlined_call_operand.vmem [shape: f32[1,16], index: 2, kind: input, shape index: {}]   ;;  %s296_s3 = inlined_call_operand.vmem [shape: f32[96,16], index: 3, kind: output, shape index: {}]  }
   0x1   :  { %v26_v0 = vld [vmem:[%s293_s1] sm:$0x3]  ;;  %v20_v1 = vld [vmem:[%s294_s0 + $0x30] sm:$0xff]  ;;  %v23_v2 = vld [vmem:[%s294_s0 + $0x48] sm:$0xff] }
   0x2   :  { %168 = vmatpush.msk.msra.mxu2 %vm68_vm0, %v26_v0  ;;  %169 = vmatpush.msk.msra.mxu3 %vm68_vm0, %v26_v0  ;;  %v14_v3 = vld [vmem:[%s294_s0] sm:$0xff]  ;;  %v17_v4 = vld [vmem:[%s294_s0 + $0x18] sm:$0xff]  ;;  %v24_v6 = vld [vmem:[%s294_s0 + $0x50] sm:$0xff] }
   0x3   :  { %161 = vmatmul.msk.f32.vlgmr.msra.gmra.mxu2 %vm31_vm1, %v20_v1  ;;  %164 = vmatmul.msk.f32.vlgmr.msra.gmra.mxu3 %vm31_vm1, %v23_v2  ;;  %v21_v5 = vld [vmem:[%s294_s0 + $0x38] sm:$0xff]  ;;  %v15_v7 = vld [vmem:[%s294_s0 + $0x8] sm:$0xff]  ;;  %v18_v8 = vld [vmem:[%s294_s0 + $0x20] sm:$0xff] }
   0x4   :  { %154 = vmatpush.msk.msra.mxu0 %vm68_vm0, %v26_v0  ;;  %167 = vmatpush.msk.msra.mxu1 %vm68_vm0, %v26_v0  ;;  %v22_v9 = vld [vmem:[%s294_s0 + $0x40] sm:$0xff]  ;;  %v25_v10 = vld [vmem:[%s294_s0 + $0x58] sm:$0xff]  ;;  %v16_v11 = vld [vmem:[%s294_s0 + $0x10] sm:$0xff] }
   0x5   :  { %155 = vmatmul.msk.f32.vlgmr.msra.gmra.mxu0 %vm31_vm1, %v14_v3  ;;  %158 = vmatmul.msk.f32.vlgmr.msra.gmra.mxu1 %vm31_vm1, %v17_v4  ;;  %v19_v12 = vld [vmem:[%s294_s0 + $0x28] sm:$0xff]  ;;  %v170_v13 = vld [vmem:[%s295_s2] ss:$0 sm:$0xff] }
   0xb   :  { %162 = vmatmul.msk.f32.gmra.mxu2 %vm31_vm1, %v21_v5  ;;  %165 = vmatmul.msk.f32.gmra.mxu3 %vm31_vm1, %v24_v6 }
   0xd   :  { %156 = vmatmul.msk.f32.gmra.mxu0 %vm31_vm1, %v15_v7  ;;  %159 = vmatmul.msk.f32.gmra.mxu1 %vm31_vm1, %v18_v8 }
  0x13   :  { %163 = vmatmul.msk.f32.gmra.mxu2 %vm31_vm1, %v22_v9  ;;  %166 = vmatmul.msk.f32.gmra.mxu3 %vm31_vm1, %v25_v10 }
  0x15   :  { %157 = vmatmul.msk.f32.gmra.mxu0 %vm31_vm1, %v16_v11  ;;  %160 = vmatmul.msk.f32.gmra.mxu1 %vm31_vm1, %v19_v12 }
  0x82   :  { %v89_v14 = vpop.f32.mrf.mxu0  ;;  %v98_v15 = vpop.f32.mrf.mxu1 }
  0x83   :  { %v90_v16 = vadd.f32 %v170_v13, %v89_v14  ;;  %v99_v17 = vadd.f32 %v170_v13, %v98_v15 }
  0x85   :  { %v125_v18 = vmax.f32 %v90_v16, 0.0  ;;  %v128_v19 = vmax.f32 %v99_v17, 0.0 }
  0x86   :  { %v107_v20 = vpop.f32.mrf.mxu2  ;;  %v116_v21 = vpop.f32.mrf.mxu3 }
  0x87   :  { %138 = vst.msk [vmem:[%s296_s3] sm:$0xff] %vm137_vm2, %v125_v18  ;;  %v108_v22 = vadd.f32 %v170_v13, %v107_v20  ;;  %v117_v23 = vadd.f32 %v170_v13, %v116_v21 }
  0x88   :  { %141 = vst.msk [vmem:[%s296_s3 + $0x18] sm:$0xff] %vm137_vm2, %v128_v19 }
  0x89   :  { %v131_v24 = vmax.f32 %v108_v22, 0.0  ;;  %v134_v25 = vmax.f32 %v117_v23, 0.0 }
  0x8a   :  { %v92_v26 = vpop.f32.mrf.mxu0  ;;  %v101_v27 = vpop.f32.mrf.mxu1 }
  0x8b   :  { %144 = vst.msk [vmem:[%s296_s3 + $0x30] sm:$0xff] %vm137_vm2, %v131_v24  ;;  %v93_v28 = vadd.f32 %v170_v13, %v92_v26  ;;  %v102_v29 = vadd.f32 %v170_v13, %v101_v27 }
  0x8c   :  { %147 = vst.msk [vmem:[%s296_s3 + $0x48] sm:$0xff] %vm137_vm2, %v134_v25 }
  0x8d   :  { %v126_v30 = vmax.f32 %v93_v28, 0.0  ;;  %v129_v31 = vmax.f32 %v102_v29, 0.0 }
  0x8e   :  { %v110_v32 = vpop.f32.mrf.mxu2  ;;  %v119_v33 = vpop.f32.mrf.mxu3 }
  0x8f   :  { %139 = vst.msk [vmem:[%s296_s3 + $0x8] sm:$0xff] %vm137_vm2, %v126_v30  ;;  %v111_v34 = vadd.f32 %v170_v13, %v110_v32  ;;  %v120_v35 = vadd.f32 %v170_v13, %v119_v33 }
  0x90   :  { %142 = vst.msk [vmem:[%s296_s3 + $0x20] sm:$0xff] %vm137_vm2, %v129_v31 }
  0x91   :  { %v132_v36 = vmax.f32 %v111_v34, 0.0  ;;  %v135_v37 = vmax.f32 %v120_v35, 0.0 }
  0x92   :  { %v95_v38 = vpop.f32.mrf.mxu0  ;;  %v104_v39 = vpop.f32.mrf.mxu1 }
  0x93   :  { %145 = vst.msk [vmem:[%s296_s3 + $0x38] sm:$0xff] %vm137_vm2, %v132_v36  ;;  %v96_v40 = vadd.f32 %v170_v13, %v95_v38  ;;  %v105_v41 = vadd.f32 %v170_v13, %v104_v39 }
  0x94   :  { %148 = vst.msk [vmem:[%s296_s3 + $0x50] sm:$0xff] %vm137_vm2, %v135_v37 }
  0x95   :  { %v127_v42 = vmax.f32 %v96_v40, 0.0  ;;  %v130_v43 = vmax.f32 %v105_v41, 0.0 }
  0x96   :  { %v113_v44 = vpop.f32.mrf.mxu2  ;;  %v122_v45 = vpop.f32.mrf.mxu3 }
  0x97   :  { %140 = vst.msk [vmem:[%s296_s3 + $0x10] sm:$0xff] %vm137_vm2, %v127_v42  ;;  %v114_v46 = vadd.f32 %v170_v13, %v113_v44  ;;  %v123_v47 = vadd.f32 %v170_v13, %v122_v45 }
  0x98   :  { %143 = vst.msk [vmem:[%s296_s3 + $0x28] sm:$0xff] %vm137_vm2, %v130_v43 }
  0x99   :  { %v133_v48 = vmax.f32 %v114_v46, 0.0  ;;  %v136_v49 = vmax.f32 %v123_v47, 0.0 }
  0x9b   :  { %146 = vst.msk [vmem:[%s296_s3 + $0x40] sm:$0xff] %vm137_vm2, %v133_v48 }
  0x9c   :  { %149 = vst.msk [vmem:[%s296_s3 + $0x58] sm:$0xff] %vm137_vm2, %v136_v49 }

// kernel: stsgcn_forward.6
= control target key start
LH: loop header
LB: loop body
LE: loop exit
PB: predicated region body
PF: predicated region fallthrough
CT: control target
= control target key end

     0   :  { %s1019_s13 = smov 0   ;;  %s1021_s14 = smov 0   ;;  %s1158_s0 = inlined_call_operand.vmem [shape: f32[2,32,16], index: 0, kind: input, shape index: {}]   ;;  %s1159_s1 = inlined_call_operand.vmem [shape: f32[32,16], index: 1, kind: input, shape index: {}]   ;;  %s1160_s2 = inlined_call_operand.vmem [shape: f32[24,24], index: 2, kind: input, shape index: {}]   ;;  %s1161_s3 = inlined_call_operand.vmem [shape: f32[2,16,32], index: 3, kind: input, shape index: {}]   ;;  %s1162_s4 = inlined_call_operand.vmem [shape: f32[2,1,32], index: 4, kind: input, shape index: {}]   ;;  %s1163_s5 = inlined_call_operand.vmem [shape: f32[2,16,32], index: 5, kind: input, shape index: {}]   ;;  %s1164_s6 = inlined_call_operand.vmem [shape: f32[2,1,32], index: 6, kind: input, shape index: {}]   ;;  %s1165_s7 = inlined_call_operand.vmem [shape: f32[16,16], index: 7, kind: input, shape index: {}]   ;;  %s1166_s8 = inlined_call_operand.vmem [shape: f32[16,16], index: 8, kind: input, shape index: {}]   ;;  %s1167_s9 = inlined_call_operand.vmem [shape: f32[1,16], index: 9, kind: input, shape index: {}]   ;;  %s1168_s10 = inlined_call_operand.vmem [shape: f32[2,2,8,16], index: 10, kind: output, shape index: {}]  }
   0x1   :  { %s1023_s15 = smov 0   ;;  %s1025_s16 = smov 0  }
   0x2   :  { %s1027_s17 = smov 0  }
   0x3 LB: > { %s29_s18 = sadd.s32 1, %s953_s15  ;;  %s32_s19 = sadd.s32 1, %s957_s16  ;;  %s961_s17 = sphi %s1027_s17, %s20_s17   ;;  %s957_s16 = sphi %s1025_s16, %s1172_s16   ;;  %s953_s15 = sphi %s1023_s15, %s1171_s15   ;;  %s949_s14 = sphi %s1021_s14, %s1170_s14   ;;  %s945_s13 = sphi %s1019_s13, %s1169_s13  }
   0x4   : > { %p30_p0 = scmp.ge.s32.totalorder %s29_s18, 2  ;;  %p834_p1 = scmp.ge.s32.totalorder %s961_s17, 1 }
   0x5   : > { %p362_p2 = scmp.lt.s32.totalorder %s961_s17, 5 }
   0x6   : > { %s1174_s18 = smov (%p30_p0, %s29_s18), 0  ;;  %s1176_s19 = smov (!%p30_p0, %s32_s19), %s957_s16 }
   0x7   : > { %p363_p3 = pnand %p834_p1, %p362_p2  ;;  %p34_p4 = scmp.ge.s32.totalorder %s1176_s19, 2 }
   0x8   : > { %p419_p5 = scmp.lt.s32.totalorder (!%p363_p3), %s949_s14, 1  ;;  %s843_s20 = sshll.u32 (!%p363_p3), %s945_s13, 3 }
   0x9   : > { %s1178_s19 = smov (%p34_p4, %s1176_s19), 0  ;;  %366 = sbr.rel (%p363_p3) target bundleno = 860 (0x35c), region = 60 }
   0xa   : > { %s453_s23 = scalar_lea.vmem (!%p363_p3), %s1159_s1, %s843_s20  ;;  %p424_p6 = scmp.lt.s32.totalorder (!%p363_p3), %s945_s13, 1 }
   0xb   : > { %s963_s30 = smov (!%p363_p3), 112  }
   0xe   : > { %s1180_s14 = smov (!%p419_p5, %s949_s14), 1  ;;  %s1182_s13 = smov (!%p424_p6, %s945_s13), 1  ;;  %v456_v0 = vld [vmem:[%s453_s23 + $0x10] sm:$0xff]  ;;  %v455_v1 = vld [vmem:[%s453_s23 + $0x8] sm:$0xff]  ;;  %v454_v2 = vld [vmem:[%s453_s23] sm:$0xff]  ;;  %vm522_vm0 = vcmask 195584  }
   0xf   : > { %s860_s24 = sshll.u32 %s1180_s14, 5  ;;  %s861_s28 = sshll.u32 %s1182_s13, 4  ;;  %v1072_v10 = vld [vmem:[%s1160_s2] sm:$0xff]  ;;  %v1079_v11 = vld [vmem:[%s1160_s2 + $0x8] sm:$0xff]  ;;  %v1086_v12 = vld [vmem:[%s1160_s2 + $0x10] sm:$0xff]  ;;  %vm464_vm1 = vcmask 130048  }
  0x10   : > { %s423_s27 = scalar_lea.vmem %s1158_s0, %s860_s24  ;;  %s428_s12 = scalar_lea.vmem %s1161_s3, %s861_s28  ;;  %v463_v39 = vld [vmem:[%s1166_s8 + $0x8] sm:$0xff]  ;;  %v462_v40 = vld [vmem:[%s1166_s8] sm:$0xff] }
  0x11   : > { %s449_s29 = scalar_lea.vmem %s423_s27, %s843_s20  ;;  %v520_v8 = vld [vmem:[%s428_s12 + $0x8] sm:$0xff]  ;;  %v519_v13 = vld [vmem:[%s428_s12] sm:$0xff]  ;;  %482 = vmatpush.msra.mxu0 %v463_v39  ;;  %s439_s20 = scalar_lea.vmem %s1164_s6, %s1182_s13 }
  0x12   : > { %v452_v3 = vld [vmem:[%s449_s29 + $0x10] sm:$0xff]  ;;  %v451_v4 = vld [vmem:[%s449_s29 + $0x8] sm:$0xff]  ;;  %v450_v5 = vld [vmem:[%s449_s29] sm:$0xff]  ;;  %584 = vmatpush.msra.mxu3 %v520_v8  ;;  %s431_s29 = scalar_lea.vmem %s1162_s4, %s1182_s13 }
  0x13   : > { %v1066_v6 = vadd.f32 %v456_v0, %v452_v3  ;;  %v458_v7 = vadd.f32 %v455_v1, %v451_v4  ;;  %v457_v9 = vadd.f32 %v454_v2, %v450_v5  ;;  %v904_v17 = vld [vmem:[%s431_s29] ss:$0 sm:$0xff]  ;;  %483 = vmatpush.msra.mxu0 %v462_v40  ;;  %v461_v41 = vld [vmem:[%s1165_s7 + $0x8] sm:$0xff]  ;;  %s436_s29 = scalar_lea.vmem %s1163_s5, %s861_s28  ;;  %s841_s28 = sshll.u32 %s1180_s14, 1 }
  0x14   : > { %585 = vmatpush.msra.mxu3 %v519_v13  ;;  %505 = vmatpush.msra.mxu1 %v461_v41  ;;  %v460_v42 = vld [vmem:[%s1165_s7] sm:$0xff]  ;;  %v627_v49 = vld [vmem:[%s436_s29 + $0x8] sm:$0xff]  ;;  %s445_s21 = sadd.s32 %s841_s28, %s1182_s13 }
  0x15   : > { %545 = vmatpush.msra.mxu2 %v1066_v6  ;;  %844 = vmatmul.msk.f32.vlgmr.msra.gmra.mxu0 %vm464_vm1, %v1066_v6  ;;  %v626_v50 = vld [vmem:[%s436_s29] sm:$0xff]  ;;  %s842_s24 = sshll.u32 %s445_s21, 3 }
  0x16   : > { %506 = vmatpush.msra.mxu1 %v460_v42  ;;  %v906_v57 = vld [vmem:[%s439_s20] ss:$0 sm:$0xff]  ;;  %s447_s27 = scalar_lea.vmem %s1168_s10, %s842_s24 }
  0x17   : > { %546 = vmatpush.msra.mxu2 %v458_v7  ;;  %845 = vmatmul.msk.f32.vlgmr.msra.gmra.mxu1 %vm464_vm1, %v457_v9  ;;  %v905_v3 = vld [vmem:[%s1167_s9] ss:$0 sm:$0xff] }
  0x18   : > { %681 = vmatpush.msrb.mxu1 %v627_v49 }
  0x19   : > { %547 = vmatpush.msra.mxu2 %v457_v9 }
  0x1a   : > { %846 = vmatmul.msk.f32.vlgmr.msra.gmra.mxu2 %vm522_vm0, %v1072_v10  ;;  %682 = vmatpush.msrb.mxu1 %v626_v50 }
  0x22   : > { %847 = vmatmul.msk.f32.gmra.mxu2 %vm522_vm0, %v1079_v11 }
  0x2a   : > { %848 = vmatmul.msk.f32.gmra.mxu2 %vm522_vm0, %v1086_v12 }
  0x92   : > { %v485_v51 = vpop.f32.mrf.mxu0 }
  0x94   : > { %v508_v54 = vpop.f32.mrf.mxu1 }
  0x95   : > { %v509_v2 = vadd.f32 %v508_v54, %v485_v51 }
  0x97   : > { %v515_v6 = vadd.f32 %v905_v3, %v509_v2 }
  0x9d   : > { %v549_v14 = vpop.f32.mrf.mxu2 }
  0x9e   : > { %849 = vmatmul.msk.f32.vlgmr.msra.gmra.mxu3 %vm464_vm1, %v549_v14 }
  0xa5   : > { %v552_v15 = vpop.f32.mrf.mxu2 }
  0xa6   : > { %850 = vmatmul.msk.f32.gmra.mxu3 %vm464_vm1, %v552_v15 }
  0xad   : > { %v555_v16 = vpop.f32.mrf.mxu2 }
  0xae   : > { %851 = vmatmul.msk.f32.gmra.mxu3 %vm464_vm1, %v555_v16 }
 0x121   : > { %v587_v18 = vpop.f32.mrf.mxu3 }
 0x122   : > { %v588_v19 = vadd.f32 %v904_v17, %v587_v18 }
 0x124   : > { %v596_v20 = vsub.f32 0.0, %v588_v19 }
 0x126   : > { %v599_v21 = vmul.f32 1.442695, %v596_v20 }
 0x128   : > { %907 = vpow2.f32 %v599_v21 }
 0x129   : > { %v590_v22 = vpop.f32.mrf.mxu3 }
 0x12a   : > { %v591_v25 = vadd.f32 %v904_v17, %v590_v22 }
 0x12c   : > { %v597_v28 = vsub.f32 0.0, %v591_v25 }
 0x12e   : > { %v908_v23 = vpop.eup %907  ;;  %v601_v32 = vmul.f32 1.442695, %v597_v28 }
 0x12f   : > { %v605_v24 = vadd.f32 1.0, %v908_v23 }
 0x131   : > { %909 = vrcp.f32 %v605_v24  ;;  %v593_v26 = vpop.f32.mrf.mxu3 }
 0x132   : > { %v594_v27 = vadd.f32 %v904_v17, %v593_v26 }
 0x134   : > { %v598_v29 = vsub.f32 0.0, %v594_v27 }
 0x136   : > { %v603_v30 = vmul.f32 1.442695, %v598_v29 }
 0x137   : > { %v910_v31 = vpop.eup %909 }
 0x138   : > { %911 = vpow2.f32 %v603_v30  ;;  %614 = vrot.lane.b32.xlu1 %v910_v31, %s963_s30 }
 0x139   : > { %913 = vpow2.f32 %v601_v32 }
 0x13e   : > { %v912_v33 = vpop.eup %911 }
 0x13f   : > { %v607_v34 = vadd.f32 1.0, %v912_v33  ;;  %v914_v35 = vpop.eup %913 }
 0x140   : > { %v606_v36 = vadd.f32 1.0, %v914_v35 }
 0x141   : > { %915 = vrcp.f32 %v607_v34 }
 0x142   : > { %917 = vrcp.f32 %v606_v36 }
 0x147   : > { %v916_v37 = vpop.eup %915 }
 0x148   : > { %618 = vrot.lane.b32.xlu0 %v916_v37, %s963_s30  ;;  %v918_v38 = vpop.eup %917 }
 0x150   : > { %616 = vrot.lane.b32.xlu0 %v918_v38, %s963_s30 }
 0x1aa   : > { %v615_v45 = vpop.permute.xlu1 %614 }
 0x1ab   : > { %v623_v48 = vmul.f32 %v615_v45, %v588_v19 }
 0x1ba   : > { %v619_v43 = vpop.permute.xlu0 %618 }
 0x1bb   : > { %v625_v44 = vmul.f32 %v619_v43, %v594_v27 }
 0x1bd   : > { %642 = vmatpush.msrb.mxu0 %v625_v44 }
 0x1c2   : > { %v617_v46 = vpop.permute.xlu0 %616 }
 0x1c3   : > { %v624_v47 = vmul.f32 %v617_v46, %v591_v25 }
 0x1c5   : > { %643 = vmatpush.msrb.mxu0 %v624_v47 }
 0x1c7   : > { %644 = vmatpush.msrb.mxu0 %v623_v48 }
 0x1c8   : > { %852 = vmatmul.msk.f32.vlgmr.msrb.gmra.mxu0 %vm522_vm0, %v1072_v10 }
 0x1d0   : > { %853 = vmatmul.msk.f32.gmra.mxu0 %vm522_vm0, %v1079_v11 }
 0x1d8   : > { %854 = vmatmul.msk.f32.gmra.mxu0 %vm522_vm0, %v1086_v12 }
 0x245   : > { %v646_v52 = vpop.f32.mrf.mxu0 }
 0x246   : > { %855 = vmatmul.msk.f32.vlgmr.msrb.gmra.mxu1 %vm464_vm1, %v646_v52 }
 0x24d   : > { %v649_v53 = vpop.f32.mrf.mxu0 }
 0x24e   : > { %856 = vmatmul.msk.f32.gmra.mxu1 %vm464_vm1, %v649_v53 }
 0x255   : > { %v652_v55 = vpop.f32.mrf.mxu0 }
 0x256   : > { %857 = vmatmul.msk.f32.gmra.mxu1 %vm464_vm1, %v652_v55 }
 0x2c3   : > { %v684_v56 = vpop.f32.mrf.mxu1 }
 0x2cb   : > { %v686_v58 = vpop.f32.mrf.mxu1 }
 0x2cc   : > { %v687_v59 = vadd.f32 %v906_v57, %v686_v58 }
 0x2ce   : > { %v691_v60 = vsub.f32 0.0, %v687_v59 }
 0x2d0   : > { %v692_v61 = vmul.f32 1.442695, %v691_v60 }
 0x2d2   : > { %919 = vpow2.f32 %v692_v61 }
 0x2d3   : > { %v689_v1 = vpop.f32.mrf.mxu1 }
 0x2d8   : > { %v920_v62 = vpop.eup %919 }
 0x2d9   : > { %v694_v63 = vadd.f32 1.0, %v920_v62 }
 0x2db   : > { %921 = vrcp.f32 %v694_v63 }
 0x2e1   : > { %v922_v0 = vpop.eup %921 }
 0x2e2   : > { %697 = vrot.lane.b32.xlu1 %v922_v0, %s963_s30 }
 0x354   : > { %v698_v4 = vpop.permute.xlu1 %697 }
 0x355   : > { %v700_v5 = vmul.f32 %v698_v4, %v687_v59 }
 0x357   : > { %v701_v7 = vmax.f32 %v624_v47, %v700_v5 }
 0x359   : > { %v702_v8 = vadd.f32 %v701_v7, %v515_v6 }
 0x35b   : > { %703 = vst.msk [vmem:[%s447_s27] sm:$0xff] %vm464_vm1, %v702_v8 }
 0x35c PF: > { %s20_s17 = sadd.s32 1, %s961_s17   ;;  %s1169_s13 = smov %s953_s15 }
 0x35d   : > { %p17_p7 = scmp.ge.s32.totalorder %s20_s17, 6   ;;  %s1170_s14 = smov %s957_s16 }
 0x35e   : > { %s1171_s15 = smov %s1174_s18  ;;  %s1172_s16 = smov %s1178_s19 }
 0x35f   :  { %19 = sbr.rel (!%p17_p7) target bundleno = 3 (0x3), region = 104 }

// kernel: stsgcn_forward.5
= control target key start
LH: loop header
LB: loop body
LE: loop exit
PB: predicated region body
PF: predicated region fallthrough
CT: control target
= control target key end

     0   :  { %s1018_s13 = smov 0   ;;  %s1020_s14 = smov 0   ;;  %s1158_s0 = inlined_call_operand.vmem [shape: f32[2,48,16], index: 0, kind: input, shape index: {}]   ;;  %s1159_s1 = inlined_call_operand.vmem [shape: f32[48,16], index: 1, kind: input, shape index: {}]   ;;  %s1160_s2 = inlined_call_operand.vmem [shape: f32[24,24], index: 2, kind: input, shape index: {}]   ;;  %s1161_s3 = inlined_call_operand.vmem [shape: f32[4,16,32], index: 3, kind: input, shape index: {}]   ;;  %s1162_s4 = inlined_call_operand.vmem [shape: f32[4,1,32], index: 4, kind: input, shape index: {}]   ;;  %s1163_s5 = inlined_call_operand.vmem [shape: f32[4,16,32], index: 5, kind: input, shape index: {}]   ;;  %s1164_s6 = inlined_call_operand.vmem [shape: f32[4,1,32], index: 6, kind: input, shape index: {}]   ;;  %s1165_s7 = inlined_call_operand.vmem [shape: f32[16,16], index: 7, kind: input, shape index: {}]   ;;  %s1166_s8 = inlined_call_operand.vmem [shape: f32[16,16], index: 8, kind: input, shape index: {}]   ;;  %s1167_s9 = inlined_call_operand.vmem [shape: f32[1,16], index: 9, kind: input, shape index: {}]   ;;  %s1168_s10 = inlined_call_operand.vmem [shape: f32[2,4,8,16], index: 10, kind: output, shape index: {}]  }
   0x1   :  { %s1022_s15 = smov 0   ;;  %s1024_s16 = smov 0  }
   0x2   :  { %s1026_s17 = smov 0  }
   0x3 LB: > { %s29_s18 = sadd.s32 1, %s952_s15  ;;  %s32_s19 = sadd.s32 1, %s956_s16  ;;  %s960_s17 = sphi %s1026_s17, %s20_s17   ;;  %s956_s16 = sphi %s1024_s16, %s1172_s16   ;;  %s952_s15 = sphi %s1022_s15, %s1171_s15   ;;  %s948_s14 = sphi %s1020_s14, %s1170_s14   ;;  %s944_s13 = sphi %s1018_s13, %s1169_s13  }
   0x4   : > { %p30_p0 = scmp.ge.s32.totalorder %s29_s18, 4  ;;  %p834_p1 = scmp.ge.s32.totalorder %s960_s17, 1 }
   0x5   : > { %p362_p2 = scmp.lt.s32.totalorder %s960_s17, 9 }
   0x6   : > { %s1174_s18 = smov (%p30_p0, %s29_s18), 0  ;;  %s1176_s19 = smov (!%p30_p0, %s32_s19), %s956_s16 }
   0x7   : > { %p363_p3 = pnand %p834_p1, %p362_p2  ;;  %p34_p4 = scmp.ge.s32.totalorder %s1176_s19, 2 }
   0x8   : > { %p419_p5 = scmp.lt.s32.totalorder (!%p363_p3), %s948_s14, 1  ;;  %s842_s20 = sshll.u32 (!%p363_p3), %s944_s13, 3 }
   0x9   : > { %s1178_s19 = smov (%p34_p4, %s1176_s19), 0  ;;  %366 = sbr.rel (%p363_p3) target bundleno = 861 (0x35d), region = 60 }
   0xa   : > { %s453_s23 = scalar_lea.vmem (!%p363_p3), %s1159_s1, %s842_s20  ;;  %p424_p6 = scmp.lt.s32.totalorder (!%p363_p3), %s944_s13, 3 }
   0xb   : > { %s962_s30 = smov (!%p363_p3), 112  }
   0xe   : > { %s1180_s14 = smov (!%p419_p5, %s948_s14), 1  ;;  %s1182_s13 = smov (!%p424_p6, %s944_s13), 3  ;;  %v456_v0 = vld [vmem:[%s453_s23 + $0x10] sm:$0xff]  ;;  %v455_v1 = vld [vmem:[%s453_s23 + $0x8] sm:$0xff]  ;;  %v454_v2 = vld [vmem:[%s453_s23] sm:$0xff]  ;;  %vm522_vm0 = vcmask 195584  }
   0xf   : > { %s861_s24 = smul.u32 48, %s1180_s14  ;;  %s859_s25 = sshll.u32 %s1182_s13, 4  ;;  %v1073_v10 = vld [vmem:[%s1160_s2] sm:$0xff]  ;;  %v1080_v11 = vld [vmem:[%s1160_s2 + $0x8] sm:$0xff]  ;;  %v1087_v12 = vld [vmem:[%s1160_s2 + $0x10] sm:$0xff]  ;;  %vm464_vm1 = vcmask 130048  }
  0x10   : > { %s428_s11 = scalar_lea.vmem %s1161_s3, %s859_s25  ;;  %s431_s29 = scalar_lea.vmem %s1162_s4, %s1182_s13  ;;  %v463_v39 = vld [vmem:[%s1166_s8 + $0x8] sm:$0xff]  ;;  %v462_v40 = vld [vmem:[%s1166_s8] sm:$0xff] }
  0x11   : > { %s423_s28 = scalar_lea.vmem %s1158_s0, %s861_s24  ;;  %v520_v3 = vld [vmem:[%s428_s11 + $0x8] sm:$0xff]  ;;  %v519_v13 = vld [vmem:[%s428_s11] sm:$0xff]  ;;  %482 = vmatpush.msra.mxu0 %v463_v39  ;;  %s439_s21 = scalar_lea.vmem %s1164_s6, %s1182_s13 }
  0x12   : > { %s449_s12 = scalar_lea.vmem %s423_s28, %s842_s20  ;;  %584 = vmatpush.msra.mxu3 %v520_v3  ;;  %v903_v17 = vld [vmem:[%s431_s29] ss:$0 sm:$0xff]  ;;  %v461_v41 = vld [vmem:[%s1165_s7 + $0x8] sm:$0xff]  ;;  %s436_s29 = scalar_lea.vmem %s1163_s5, %s859_s25 }
  0x13   : > { %v452_v4 = vld [vmem:[%s449_s12 + $0x10] sm:$0xff]  ;;  %v451_v5 = vld [vmem:[%s449_s12 + $0x8] sm:$0xff]  ;;  %v450_v6 = vld [vmem:[%s449_s12] sm:$0xff]  ;;  %483 = vmatpush.msra.mxu0 %v462_v40  ;;  %505 = vmatpush.msra.mxu1 %v461_v41  ;;  %s840_s25 = sshll.u32 %s1180_s14, 2 }
  0x14   : > { %v459_v7 = vadd.f32 %v456_v0, %v452_v4  ;;  %v458_v8 = vadd.f32 %v455_v1, %v451_v5  ;;  %v457_v9 = vadd.f32 %v454_v2, %v450_v6  ;;  %585 = vmatpush.msra.mxu3 %v519_v13  ;;  %v460_v42 = vld [vmem:[%s1165_s7] sm:$0xff]  ;;  %v627_v49 = vld [vmem:[%s436_s29 + $0x8] sm:$0xff]  ;;  %s445_s22 = sadd.s32 %s840_s25, %s1182_s13 }
  0x15   : > { %506 = vmatpush.msra.mxu1 %v460_v42  ;;  %v626_v50 = vld [vmem:[%s436_s29] sm:$0xff]  ;;  %s841_s24 = sshll.u32 %s445_s22, 3 }
  0x16   : > { %545 = vmatpush.msra.mxu2 %v459_v7  ;;  %843 = vmatmul.msk.f32.vlgmr.msra.gmra.mxu0 %vm464_vm1, %v459_v7  ;;  %v905_v57 = vld [vmem:[%s439_s21] ss:$0 sm:$0xff]  ;;  %s447_s28 = scalar_lea.vmem %s1168_s10, %s841_s24 }
  0x17   : > { %844 = vmatmul.msk.f32.vlgmr.msra.gmra.mxu1 %vm464_vm1, %v457_v9  ;;  %v904_v3 = vld [vmem:[%s1167_s9] ss:$0 sm:$0xff] }
  0x18   : > { %546 = vmatpush.msra.mxu2 %v458_v8  ;;  %681 = vmatpush.msrb.mxu1 %v627_v49 }
  0x1a   : > { %547 = vmatpush.msra.mxu2 %v457_v9  ;;  %682 = vmatpush.msrb.mxu1 %v626_v50 }
  0x1b   : > { %845 = vmatmul.msk.f32.vlgmr.msra.gmra.mxu2 %vm522_vm0, %v1073_v10 }
  0x23   : > { %846 = vmatmul.msk.f32.gmra.mxu2 %vm522_vm0, %v1080_v11 }
  0x2b   : > { %847 = vmatmul.msk.f32.gmra.mxu2 %vm522_vm0, %v1087_v12 }
  0x93   : > { %v485_v51 = vpop.f32.mrf.mxu0 }
  0x94   : > { %v508_v54 = vpop.f32.mrf.mxu1 }
  0x95   : > { %v509_v2 = vadd.f32 %v508_v54, %v485_v51 }
  0x97   : > { %v515_v6 = vadd.f32 %v904_v3, %v509_v2 }
  0x9e   : > { %v549_v14 = vpop.f32.mrf.mxu2 }
  0x9f   : > { %848 = vmatmul.msk.f32.vlgmr.msra.gmra.mxu3 %vm464_vm1, %v549_v14 }
  0xa6   : > { %v552_v15 = vpop.f32.mrf.mxu2 }
  0xa7   : > { %849 = vmatmul.msk.f32.gmra.mxu3 %vm464_vm1, %v552_v15 }
  0xae   : > { %v555_v16 = vpop.f32.mrf.mxu2 }
  0xaf   : > { %850 = vmatmul.msk.f32.gmra.mxu3 %vm464_vm1, %v555_v16 }
 0x122   : > { %v587_v18 = vpop.f32.mrf.mxu3 }
 0x123   : > { %v588_v19 = vadd.f32 %v903_v17, %v587_v18 }
 0x125   : > { %v596_v20 = vsub.f32 0.0, %v588_v19 }
 0x127   : > { %v599_v21 = vmul.f32 1.442695, %v596_v20 }
 0x129   : > { %906 = vpow2.f32 %v599_v21 }
 0x12a   : > { %v590_v22 = vpop.f32.mrf.mxu3 }
 0x12b   : > { %v591_v25 = vadd.f32 %v903_v17, %v590_v22 }
 0x12d   : > { %v597_v28 = vsub.f32 0.0, %v591_v25 }
 0x12f   : > { %v907_v23 = vpop.eup %906  ;;  %v601_v32 = vmul.f32 1.442695, %v597_v28 }
 0x130   : > { %v605_v24 = vadd.f32 1.0, %v907_v23 }
 0x132   : > { %908 = vrcp.f32 %v605_v24  ;;  %v593_v26 = vpop.f32.mrf.mxu3 }
 0x133   : > { %v594_v27 = vadd.f32 %v903_v17, %v593_v26 }
 0x135   : > { %v598_v29 = vsub.f32 0.0, %v594_v27 }
 0x137   : > { %v603_v30 = vmul.f32 1.442695, %v598_v29 }
 0x138   : > { %v909_v31 = vpop.eup %908 }
 0x139   : > { %910 = vpow2.f32 %v603_v30  ;;  %614 = vrot.lane.b32.xlu1 %v909_v31, %s962_s30 }
 0x13a   : > { %912 = vpow2.f32 %v601_v32 }
 0x13f   : > { %v911_v33 = vpop.eup %910 }
 0x140   : > { %v607_v34 = vadd.f32 1.0, %v911_v33  ;;  %v913_v35 = vpop.eup %912 }
 0x141   : > { %v606_v36 = vadd.f32 1.0, %v913_v35 }
 0x142   : > { %914 = vrcp.f32 %v607_v34 }
 0x143   : > { %916 = vrcp.f32 %v606_v36 }
 0x148   : > { %v915_v37 = vpop.eup %914 }
 0x149   : > { %618 = vrot.lane.b32.xlu0 %v915_v37, %s962_s30  ;;  %v917_v38 = vpop.eup %916 }
 0x151   : > { %616 = vrot.lane.b32.xlu0 %v917_v38, %s962_s30 }
 0x1ab   : > { %v615_v45 = vpop.permute.xlu1 %614 }
 0x1ac   : > { %v623_v48 = vmul.f32 %v615_v45, %v588_v19 }
 0x1bb   : > { %v619_v43 = vpop.permute.xlu0 %618 }
 0x1bc   : > { %v625_v44 = vmul.f32 %v619_v43, %v594_v27 }
 0x1be   : > { %642 = vmatpush.msrb.mxu0 %v625_v44 }
 0x1c3   : > { %v617_v46 = vpop.permute.xlu0 %616 }
 0x1c4   : > { %v624_v47 = vmul.f32 %v617_v46, %v591_v25 }
 0x1c6   : > { %643 = vmatpush.msrb.mxu0 %v624_v47 }
 0x1c8   : > { %644 = vmatpush.msrb.mxu0 %v623_v48 }
 0x1c9   : > { %851 = vmatmul.msk.f32.vlgmr.msrb.gmra.mxu0 %vm522_vm0, %v1073_v10 }
 0x1d1   : > { %852 = vmatmul.msk.f32.gmra.mxu0 %vm522_vm0, %v1080_v11 }
 0x1d9   : > { %853 = vmatmul.msk.f32.gmra.mxu0 %vm522_vm0, %v1087_v12 }
 0x246   : > { %v646_v52 = vpop.f32.mrf.mxu0 }
 0x247   : > { %854 = vmatmul.msk.f32.vlgmr.msrb.gmra.mxu1 %vm464_vm1, %v646_v52 }
 0x24e   : > { %v649_v53 = vpop.f32.mrf.mxu0 }
 0x24f   : > { %855 = vmatmul.msk.f32.gmra.mxu1 %vm464_vm1, %v649_v53 }
 0x256   : > { %v652_v55 = vpop.f32.mrf.mxu0 }
 0x257   : > { %856 = vmatmul.msk.f32.gmra.mxu1 %vm464_vm1, %v652_v55 }
 0x2c4   : > { %v684_v56 = vpop.f32.mrf.mxu1 }
 0x2cc   : > { %v686_v58 = vpop.f32.mrf.mxu1 }
 0x2cd   : > { %v687_v59 = vadd.f32 %v905_v57, %v686_v58 }
 0x2cf   : > { %v691_v60 = vsub.f32 0.0, %v687_v59 }
 0x2d1   : > { %v692_v61 = vmul.f32 1.442695, %v691_v60 }
 0x2d3   : > { %918 = vpow2.f32 %v692_v61 }
 0x2d4   : > { %v689_v1 = vpop.f32.mrf.mxu1 }
 0x2d9   : > { %v919_v62 = vpop.eup %918 }
 0x2da   : > { %v694_v63 = vadd.f32 1.0, %v919_v62 }
 0x2dc   : > { %920 = vrcp.f32 %v694_v63 }
 0x2e2   : > { %v921_v0 = vpop.eup %920 }
 0x2e3   : > { %697 = vrot.lane.b32.xlu1 %v921_v0, %s962_s30 }
 0x355   : > { %v698_v4 = vpop.permute.xlu1 %697 }
 0x356   : > { %v700_v5 = vmul.f32 %v698_v4, %v687_v59 }
 0x358   : > { %v701_v7 = vmax.f32 %v624_v47, %v700_v5 }
 0x35a   : > { %v702_v8 = vadd.f32 %v701_v7, %v515_v6 }
 0x35c   : > { %703 = vst.msk [vmem:[%s447_s28] sm:$0xff] %vm464_vm1, %v702_v8 }
 0x35d PF: > { %s20_s17 = sadd.s32 1, %s960_s17   ;;  %s1169_s13 = smov %s952_s15 }
 0x35e   : > { %p17_p7 = scmp.ge.s32.totalorder %s20_s17, 10   ;;  %s1170_s14 = smov %s956_s16 }
 0x35f   : > { %s1171_s15 = smov %s1174_s18  ;;  %s1172_s16 = smov %s1178_s19 }
 0x360   :  { %19 = sbr.rel (!%p17_p7) target bundleno = 3 (0x3), region = 104 }

// kernel: stsgcn_forward.7
= control target key start
LH: loop header
LB: loop body
LE: loop exit
PB: predicated region body
PF: predicated region fallthrough
CT: control target
= control target key end

     0   :  { %vm30_vm0 = vcmask 261120   ;;  %vm78_vm1 = vcmask 785408   ;;  %vm108_vm2 = vcmask 23552   ;;  %s231_s1 = inlined_call_operand.vmem [shape: f32[32,96], index: 1, kind: input, shape index: {}]   ;;  %s232_s3 = inlined_call_operand.vmem [shape: f32[96,3], index: 3, kind: input, shape index: {}]   ;;  %s233_s0 = inlined_call_operand.vmem [shape: f32[16,32], index: 0, kind: input, shape index: {}]   ;;  %s234_s2 = inlined_call_operand.vmem [shape: f32[1,96], index: 2, kind: input, shape index: {}]   ;;  %s235_s4 = inlined_call_operand.vmem [shape: f32[1,3], index: 4, kind: input, shape index: {}]   ;;  %s236_s5 = inlined_call_operand.vmem [shape: f32[16,3], index: 5, kind: output, shape index: {}]  }
   0x1   :  { %v25_v0 = vld [vmem:[%s231_s1 + $0x18] sm:$0xff]  ;;  %v24_v1 = vld [vmem:[%s231_s1 + $0x10] sm:$0xff]  ;;  %v23_v2 = vld [vmem:[%s231_s1 + $0x8] sm:$0xff] }
   0x2   :  { %49 = vmatpush.msra.mxu0 %v25_v0  ;;  %v73_v3 = vld [vmem:[%s232_s3 + $0x58] sm:$0xff]  ;;  %v72_v4 = vld [vmem:[%s232_s3 + $0x50] sm:$0xff]  ;;  %v22_v5 = vld [vmem:[%s231_s1] sm:$0xff] }
   0x3   :  { %89 = vmatpush.msra.mxu1 %v73_v3  ;;  %v71_v6 = vld [vmem:[%s232_s3 + $0x48] sm:$0xff]  ;;  %119 = vmatpush.msra.mxu2 %v73_v3  ;;  %v20_v7 = vld [vmem:[%s233_s0] sm:$0xff]  ;;  %v69_v9 = vld [vmem:[%s232_s3 + $0x38] sm:$0xff] }
   0x4   :  { %50 = vmatpush.msra.mxu0 %v24_v1  ;;  %v70_v8 = vld [vmem:[%s232_s3 + $0x40] sm:$0xff]  ;;  %v68_v10 = vld [vmem:[%s232_s3 + $0x30] sm:$0xff]  ;;  %v67_v11 = vld [vmem:[%s232_s3 + $0x28] sm:$0xff] }
   0x5   :  { %90 = vmatpush.msra.mxu1 %v72_v4  ;;  %120 = vmatpush.msra.mxu2 %v72_v4  ;;  %v21_v12 = vld [vmem:[%s233_s0 + $0x8] sm:$0xff]  ;;  %v66_v13 = vld [vmem:[%s232_s3 + $0x20] sm:$0xff]  ;;  %v65_v14 = vld [vmem:[%s232_s3 + $0x18] sm:$0xff] }
   0x6   :  { %51 = vmatpush.msra.mxu0 %v23_v2  ;;  %v64_v15 = vld [vmem:[%s232_s3 + $0x10] sm:$0xff]  ;;  %v63_v16 = vld [vmem:[%s232_s3 + $0x8] sm:$0xff]  ;;  %v62_v17 = vld [vmem:[%s232_s3] sm:$0xff] }
   0x7   :  { %91 = vmatpush.msra.mxu1 %v71_v6  ;;  %121 = vmatpush.msra.mxu2 %v71_v6  ;;  %v131_v18 = vld [vmem:[%s234_s2] ss:$0 sm:$0xff] }
   0x8   :  { %52 = vmatpush.msra.mxu0 %v22_v5  ;;  %v132_v25 = vld [vmem:[%s235_s4] ss:$0 sm:$0xff] }
   0x9   :  { %115 = vmatmul.msk.f32.vlgmr.msra.gmra.mxu0 %vm30_vm0, %v20_v7  ;;  %92 = vmatpush.msra.mxu1 %v70_v8 }
   0xa   :  { %122 = vmatpush.msra.mxu2 %v70_v8 }
   0xb   :  { %93 = vmatpush.msra.mxu1 %v69_v9 }
   0xc   :  { %123 = vmatpush.msra.mxu2 %v69_v9 }
   0xd   :  { %94 = vmatpush.msra.mxu1 %v68_v10 }
   0xe   :  { %124 = vmatpush.msra.mxu2 %v68_v10 }
   0xf   :  { %95 = vmatpush.msra.mxu1 %v67_v11 }
  0x10   :  { %125 = vmatpush.msra.mxu2 %v67_v11 }
  0x11   :  { %116 = vmatmul.msk.f32.gmra.mxu0 %vm30_vm0, %v21_v12  ;;  %96 = vmatpush.msra.mxu1 %v66_v13 }
  0x12   :  { %126 = vmatpush.msra.mxu2 %v66_v13 }
  0x13   :  { %97 = vmatpush.msra.mxu1 %v65_v14 }
  0x14   :  { %127 = vmatpush.msra.mxu2 %v65_v14 }
  0x15   :  { %98 = vmatpush.msra.mxu1 %v64_v15 }
  0x16   :  { %128 = vmatpush.msra.mxu2 %v64_v15 }
  0x17   :  { %99 = vmatpush.msra.mxu1 %v63_v16 }
  0x18   :  { %129 = vmatpush.msra.mxu2 %v63_v16 }
  0x19   :  { %100 = vmatpush.msra.mxu1 %v62_v17 }
  0x1a   :  { %130 = vmatpush.msra.mxu2 %v62_v17 }
  0x86   :  { %v54_v19 = vpop.f32.mrf.mxu0 }
  0x87   :  { %v55_v20 = vadd.f32 %v131_v18, %v54_v19 }
  0x89   :  { %v60_v21 = vmax.f32 %v55_v20, 0.0 }
  0x8b   :  { %117 = vmatmul.msk.f32.vlgmr.msra.gmra.mxu1 %vm78_vm1, %v60_v21 }
  0x8e   :  { %v57_v22 = vpop.f32.mrf.mxu0 }
  0x8f   :  { %v58_v23 = vadd.f32 %v131_v18, %v57_v22 }
  0x91   :  { %v61_v24 = vmax.f32 %v58_v23, 0.0 }
  0x93   :  { %118 = vmatmul.msk.f32.vlgmr.msra.gmra.mxu2 %vm78_vm1, %v61_v24 }
 0x108   :  { %v102_v26 = vpop.f32.mrf.mxu1 }
 0x109   :  { %v103_v27 = vadd.f32 %v132_v25, %v102_v26 }
 0x10b   :  { %109 = vst.msk [vmem:[%s236_s5] sm:$0xff] %vm108_vm2, %v103_v27 }
 0x116   :  { %v105_v28 = vpop.f32.mrf.mxu2 }
 0x117   :  { %v106_v29 = vadd.f32 %v132_v25, %v105_v28 }
 0x119   :  { %110 = vst.msk [vmem:[%s236_s5 + $0x8] sm:$0xff] %vm108_vm2, %v106_v29 }

</bundles_post_ra>
